<compile_context>
chip_gen: v6e
topology: v6e:2x2x1
jax: 0.10.0
libtpu: 0.0.40
codegen_flags: <defaults>
</compile_context>

<pallas_src>
import functools

import jax
import jax.numpy as jnp
from jax import lax
from jax.experimental import pallas as pl
from jax.experimental.pallas import tpu as pltpu

EPS = 1e-5


# ------------------------------ fused kernel ---------------------------------

def _fused_bottleneck_kernel(
    x_ref, wa_ref, sa_ref, ba_ref, wb_ref, sb_ref, bb_ref, wc_ref, sc_ref,
    bc_ref, o_ref, ya_pad, *,
    H, W, Cin, width, planes, groups, cpg, dilation, tile_h, compute_dtype):
  d = dilation
  t = pl.program_id(1)

  # ---- stage a: 1x1 conv + BN + ReLU for the whole image, once per batch
  # element, into a zero-padded VMEM scratch (persists across row tiles).
  @pl.when(t == 0)
  def _stage_a():
    ya_pad[...] = jnp.zeros_like(ya_pad)          # zero borders (halo)
    x_full = x_ref[0].reshape(H * W, Cin).astype(compute_dtype)
    ya = jnp.dot(x_full, wa_ref[...], preferred_element_type=jnp.float32)
    ya = jnp.maximum(ya * sa_ref[...] + ba_ref[...], 0.0)
    ya_pad[pl.ds(d, H), pl.ds(d, W), :] = ya.reshape(H, W, width)

  # ---- stage b (grouped 3x3 conv + BN + ReLU) and stage c (1x1 conv) for this
  # row tile; stage-c GEMM accumulated per group so yb never materialises.
  r0 = t * tile_h                                  # first output row of tile
  m = tile_h * W
  acc = jnp.zeros((m, planes), jnp.float32)
  for g in range(groups):                          # static unroll (small)
    taps = []
    for ky in range(3):
      for kx in range(3):
        patch = ya_pad[pl.ds(r0 + ky * d, tile_h),
                       pl.ds(kx * d, W),
                       pl.ds(g * cpg, cpg)]
        taps.append(patch.reshape(m, cpg))
    # one GEMM per group with K = 9*cpg (im2col slab built in VMEM/vregs)
    slab = jnp.concatenate(taps, axis=1).astype(compute_dtype)   # (m, 9*cpg)
    yb_g = jnp.dot(slab, wb_ref[g], preferred_element_type=jnp.float32)
    yb_g = jnp.maximum(yb_g * sb_ref[g] + bb_ref[g], 0.0)
    acc = acc + jnp.dot(yb_g.astype(compute_dtype), wc_ref[g],
                        preferred_element_type=jnp.float32)

  # ---- stage c epilogue: BN + identity residual + ReLU
  resid = x_ref[0, pl.ds(r0, tile_h), :, :].reshape(m, planes)
  yc = acc * sc_ref[...] + bc_ref[...] + resid.astype(jnp.float32)
  o_ref[...] = jnp.maximum(yc, 0.0).reshape(1, tile_h, W, planes).astype(o_ref.dtype)


# ------------------------------ wrapper ---------------------------------------

def _fold_bn(bn):
  s = bn["gamma"] / jnp.sqrt(bn["var"] + EPS)
  b = bn["beta"] - bn["mean"] * s
  return s.reshape(1, -1).astype(jnp.float32), b.reshape(1, -1).astype(jnp.float32)


def _largest_divisor_at_most(total, want):
  t = max(1, min(want, total))
  while total % t:
    t -= 1
  return t


def regnet_bottleneck(x_nchw, p, *, stride=1, dilation=1, tile_h=8,
                      compute_dtype=jnp.bfloat16):
  groups, width = p["groups"], p["width"]
  planes = p["w_c"].shape[0]
  N, Cin, H, W = x_nchw.shape
  cpg = width // groups
  d = dilation

  # TODO(synk): downsample (projection conv + BN) branch not implemented;
  # identity residual only (requires stride == 1 and Cin == planes).
  assert stride == 1 and Cin == planes, "no-downsample configuration required"

  cd = compute_dtype
  x = jnp.transpose(x_nchw, (0, 2, 3, 1))                        # NHWC

  # stage a: (Cin, width) weight, BN folded.
  w_a = jnp.transpose(p["w_a"][:, :, 0, 0], (1, 0)).astype(cd)
  sa, ba = _fold_bn(p["bn_a"])

  # stage b: keep grouped weight grouped -> (groups, 9*cpg, cpg), K index
  # ordered ((ky*3 + kx)*cpg + ci) to match the in-kernel im2col slab.
  wb = p["w_b"].reshape(groups, cpg, cpg, 3, 3)                  # (g, co, ci, ky, kx)
  wb = jnp.transpose(wb, (0, 3, 4, 2, 1)).reshape(groups, 9 * cpg, cpg).astype(cd)
  sb, bb = _fold_bn(p["bn_b"])
  sb_g = sb.reshape(groups, 1, cpg)
  bb_g = bb.reshape(groups, 1, cpg)

  # stage c: weight split per input group -> (groups, cpg, planes).
  w_c = jnp.transpose(p["w_c"][:, :, 0, 0], (1, 0)).reshape(
      groups, cpg, planes).astype(cd)
  sc, bc = _fold_bn(p["bn_c"])

  Ho, Wo = H, W                                                  # stride == 1
  th = _largest_divisor_at_most(Ho, tile_h)
  grid = (N, Ho // th)

  kernel = functools.partial(
      _fused_bottleneck_kernel, H=H, W=W, Cin=Cin, width=width, planes=planes,
      groups=groups, cpg=cpg, dilation=d, tile_h=th, compute_dtype=cd)

  out = pl.pallas_call(
      kernel,
      out_shape=jax.ShapeDtypeStruct((N, Ho, Wo, planes), x.dtype),
      grid_spec=pltpu.PrefetchScalarGridSpec(
          num_scalar_prefetch=0,
          grid=grid,
          in_specs=[
              # full image, resident across the row-tile axis (DMA'd once / n)
              pl.BlockSpec((1, H, W, Cin), lambda n, t: (n, 0, 0, 0)),
              pl.BlockSpec((Cin, width), lambda n, t: (0, 0)),
              pl.BlockSpec((1, width), lambda n, t: (0, 0)),
              pl.BlockSpec((1, width), lambda n, t: (0, 0)),
              pl.BlockSpec((groups, 9 * cpg, cpg), lambda n, t: (0, 0, 0)),
              pl.BlockSpec((groups, 1, cpg), lambda n, t: (0, 0, 0)),
              pl.BlockSpec((groups, 1, cpg), lambda n, t: (0, 0, 0)),
              pl.BlockSpec((groups, cpg, planes), lambda n, t: (0, 0, 0)),
              pl.BlockSpec((1, planes), lambda n, t: (0, 0)),
              pl.BlockSpec((1, planes), lambda n, t: (0, 0)),
          ],
          out_specs=pl.BlockSpec((1, th, Wo, planes), lambda n, t: (n, t, 0, 0)),
          scratch_shapes=[
              # padded stage-a activation, persists across row tiles
              pltpu.VMEM((H + 2 * d, W + 2 * d, width), jnp.float32),
          ],
      ),
      compiler_params=pltpu.CompilerParams(
          dimension_semantics=("parallel", "arbitrary")),
  )(x, w_a, sa, ba, wb, sb_g, bb_g, w_c, sc, bc)

  return jnp.transpose(out, (0, 3, 1, 2))                        # back to NCHW


# ------------------------------ params / reference ----------------------------

def make_params(key, inplanes, planes, group_width):
  groups = int(planes // group_width) if group_width is not None else 1
  width = int(planes // groups) * groups
  ks = jax.random.split(key, 6)

  def bn(k, c):
    k1, k2, k3, k4 = jax.random.split(k, 4)
    return dict(gamma=1.0 + 0.1 * jax.random.normal(k1, (c,), jnp.float32),
                beta=0.1 * jax.random.normal(k2, (c,), jnp.float32),
                mean=0.1 * jax.random.normal(k3, (c,), jnp.float32),
                var=0.5 + jnp.abs(jax.random.normal(k4, (c,), jnp.float32)))

  return dict(
      groups=groups, width=width,
      w_a=0.2 * jax.random.normal(ks[0], (width, inplanes, 1, 1), jnp.float32),
      bn_a=bn(ks[1], width),
      w_b=0.2 * jax.random.normal(ks[2], (width, width // groups, 3, 3), jnp.float32),
      bn_b=bn(ks[3], width),
      w_c=0.2 * jax.random.normal(ks[4], (planes, width, 1, 1), jnp.float32),
      bn_c=bn(ks[5], planes),
  )


def ref_forward(x, p, *, stride=1, dilation=1, compute_dtype=jnp.float32):
  cd = compute_dtype

  def conv(x, w, stride=1, dilation=1, groups=1, pad=0):
    return lax.conv_general_dilated(
        x.astype(cd), w.astype(cd), (stride, stride), [(pad, pad), (pad, pad)],
        rhs_dilation=(dilation, dilation),
        dimension_numbers=("NCHW", "OIHW", "NCHW"),
        feature_group_count=groups,
        preferred_element_type=jnp.float32)

  def bn(x, b):
    s = b["gamma"] / jnp.sqrt(b["var"] + EPS)
    return x * s[None, :, None, None] + (b["beta"] - b["mean"] * s)[None, :, None, None]

  out = jax.nn.relu(bn(conv(x, p["w_a"]), p["bn_a"]))
  out = jax.nn.relu(bn(conv(out, p["w_b"], stride, dilation, p["groups"],
                            dilation), p["bn_b"]))
  out = bn(conv(out, p["w_c"]), p["bn_c"])
  return jax.nn.relu(out + x)


# ------------------------------ main ------------------------------------------

if __name__ == "__main__":
  inplanes, planes, group_width = 8, 8, 4    # groups = 2, width = 8, cpg = 4
  stride, dilation = 1, 1
  N, H, W = 2, 16, 16

  key = jax.random.PRNGKey(0)
  kx, kp = jax.random.split(key)
  x = jax.random.normal(kx, (N, inplanes, H, W), jnp.float32)
  params = make_params(kp, inplanes, planes, group_width)

  # bf16-MXU path (default / perf path), checked against a precision-matched
  # lax.conv reference (bf16 operands, f32 accumulation + f32 BN/ReLU).
  out_bf16 = regnet_bottleneck(x, params, stride=stride, dilation=dilation,
                               compute_dtype=jnp.bfloat16)
  out_bf16 = jax.block_until_ready(out_bf16)
  ref_bf16 = ref_forward(x, params, stride=stride, dilation=dilation,
                         compute_dtype=jnp.bfloat16)
  assert out_bf16.shape == ref_bf16.shape
  assert float(jnp.max(jnp.abs(out_bf16 - ref_bf16))) < 5e-3

  # pure-f32 path, tight check against the plain f32 reference.
  out_f32 = regnet_bottleneck(x, params, stride=stride, dilation=dilation,
                              compute_dtype=jnp.float32)
  out_f32 = jax.block_until_ready(out_f32)
  ref_f32 = ref_forward(x, params, stride=stride, dilation=dilation,
                        compute_dtype=jnp.float32)
  assert out_f32.shape == ref_f32.shape
  assert float(jnp.max(jnp.abs(out_f32 - ref_f32))) < 2e-3

  print("KERNEL_OK")
</pallas_src>

<mosaic_0001>
module attributes {stable_mosaic.version = 11 : i64} {
  func.func @_fused_bottleneck_kernel(%arg0: i32, %arg1: i32, %arg2: memref<1x16x16x8xf32, #tpu.memory_space<vmem>>, %arg3: memref<8x8xbf16, #tpu.memory_space<vmem>>, %arg4: memref<1x8xf32, #tpu.memory_space<vmem>>, %arg5: memref<1x8xf32, #tpu.memory_space<vmem>>, %arg6: memref<2x36x4xbf16, #tpu.memory_space<vmem>>, %arg7: memref<2x1x4xf32, #tpu.memory_space<vmem>>, %arg8: memref<2x1x4xf32, #tpu.memory_space<vmem>>, %arg9: memref<2x4x8xbf16, #tpu.memory_space<vmem>>, %arg10: memref<1x8xf32, #tpu.memory_space<vmem>>, %arg11: memref<1x8xf32, #tpu.memory_space<vmem>>, %arg12: memref<1x8x16x8xf32, #tpu.memory_space<vmem>>, %arg13: memref<18x18x8xf32, #tpu.memory_space<vmem>>) attributes {dimension_semantics = [#tpu.dimension_semantics<parallel>, #tpu.dimension_semantics<arbitrary>], iteration_bounds = array<i64: 2, 2>, scalar_prefetch = 0 : i64, scratch_operands = 1 : i64, tpu.core_type = #tpu.core_type<tc>, window_params = [{transform_indices = @transform_0, window_bounds = array<i64: 1, 16, 16, 8>}, {pipeline_mode = #tpu.pipeline_mode<synchronous>, transform_indices = @transform_1, window_bounds = array<i64: 8, 8>}, {pipeline_mode = #tpu.pipeline_mode<synchronous>, transform_indices = @transform_2, window_bounds = array<i64: 1, 8>}, {pipeline_mode = #tpu.pipeline_mode<synchronous>, transform_indices = @transform_3, window_bounds = array<i64: 1, 8>}, {pipeline_mode = #tpu.pipeline_mode<synchronous>, transform_indices = @transform_4, window_bounds = array<i64: 2, 36, 4>}, {pipeline_mode = #tpu.pipeline_mode<synchronous>, transform_indices = @transform_5, window_bounds = array<i64: 2, 1, 4>}, {pipeline_mode = #tpu.pipeline_mode<synchronous>, transform_indices = @transform_6, window_bounds = array<i64: 2, 1, 4>}, {pipeline_mode = #tpu.pipeline_mode<synchronous>, transform_indices = @transform_7, window_bounds = array<i64: 2, 4, 8>}, {pipeline_mode = #tpu.pipeline_mode<synchronous>, transform_indices = @transform_8, window_bounds = array<i64: 1, 8>}, {pipeline_mode = #tpu.pipeline_mode<synchronous>, transform_indices = @transform_9, window_bounds = array<i64: 1, 8>}, {transform_indices = @transform_10, window_bounds = array<i64: 1, 8, 16, 8>}]} {
    %c0_i32 = arith.constant 0 : i32
    %0 = arith.cmpi eq, %arg1, %c0_i32 : i32
    %1 = arith.extui %0 : i1 to i32
    %c0_i32_0 = arith.constant 0 : i32
    %2 = arith.cmpi ne, %1, %c0_i32_0 : i32
    scf.if %2 {
      %cst_91 = arith.constant 0.000000e+00 : f32
      %132 = vector.broadcast %cst_91 : f32 to vector<18x18x8xf32>
      %c0_92 = arith.constant 0 : index
      %c0_93 = arith.constant 0 : index
      %c0_94 = arith.constant 0 : index
      %133 = vector.load %arg13[%c0_92, %c0_93, %c0_94] : memref<18x18x8xf32, #tpu.memory_space<vmem>>, vector<18x18x8xf32>
      tpu.vector_store %arg13[%c0_92, %c0_93, %c0_94], %132 {strides = array<i32>} : memref<18x18x8xf32, #tpu.memory_space<vmem>>, vector<18x18x8xf32>,
      %c0_95 = arith.constant 0 : index
      %c0_96 = arith.constant 0 : index
      %c0_97 = arith.constant 0 : index
      %c0_98 = arith.constant 0 : index
      %134 = vector.load %arg2[%c0_95, %c0_96, %c0_97, %c0_98] : memref<1x16x16x8xf32, #tpu.memory_space<vmem>>, vector<1x16x16x8xf32>
      %135 = vector.shape_cast %134 : vector<1x16x16x8xf32> to vector<16x16x8xf32>
      %136 = vector.shape_cast %135 : vector<16x16x8xf32> to vector<256x8xf32>
      %137 = arith.truncf %136 : vector<256x8xf32> to vector<256x8xbf16>
      %c0_99 = arith.constant 0 : index
      %c0_100 = arith.constant 0 : index
      %138 = vector.load %arg3[%c0_99, %c0_100] : memref<8x8xbf16, #tpu.memory_space<vmem>>, vector<8x8xbf16>
      %cst_101 = arith.constant dense<0.000000e+00> : vector<256x8xf32>
      %139 = tpu.matmul %137, %138, %cst_101 {dimension_numbers = #tpu.dot_dimension_numbers<[1], [0], [0], [1], [0, 0, 1, 1], [], []>} : vector<256x8xbf16>, vector<8x8xbf16>, vector<256x8xf32> -> vector<256x8xf32>
      %c0_102 = arith.constant 0 : index
      %c0_103 = arith.constant 0 : index
      %140 = vector.load %arg4[%c0_102, %c0_103] : memref<1x8xf32, #tpu.memory_space<vmem>>, vector<1x8xf32>
      %141 = vector.broadcast %140 : vector<1x8xf32> to vector<256x8xf32>
      %142 = arith.mulf %139, %141 : vector<256x8xf32>
      %c0_104 = arith.constant 0 : index
      %c0_105 = arith.constant 0 : index
      %143 = vector.load %arg5[%c0_104, %c0_105] : memref<1x8xf32, #tpu.memory_space<vmem>>, vector<1x8xf32>
      %144 = vector.broadcast %143 : vector<1x8xf32> to vector<256x8xf32>
      %145 = arith.addf %142, %144 : vector<256x8xf32>
      %cst_106 = arith.constant 0.000000e+00 : f32
      %146 = vector.broadcast %cst_106 : f32 to vector<256x8xf32>
      %147 = arith.maximumf %145, %146 : vector<256x8xf32>
      %148 = vector.shape_cast %147 : vector<256x8xf32> to vector<16x16x8xf32>
      %c1_107 = arith.constant 1 : index
      %c1_108 = arith.constant 1 : index
      %c0_109 = arith.constant 0 : index
      %149 = vector.load %arg13[%c1_107, %c1_108, %c0_109] : memref<18x18x8xf32, #tpu.memory_space<vmem>>, vector<16x16x8xf32>
      tpu.vector_store %arg13[%c1_107, %c1_108, %c0_109], %148 {strides = array<i32>} : memref<18x18x8xf32, #tpu.memory_space<vmem>>, vector<16x16x8xf32>,
    } else {
    }
    %c8_i32 = arith.constant 8 : i32
    %3 = arith.muli %arg1, %c8_i32 : i32
    %cst = arith.constant 0.000000e+00 : f32
    %4 = vector.broadcast %cst : f32 to vector<128x8xf32>
    %c0_i32_1 = arith.constant 0 : i32
    %5 = arith.addi %3, %c0_i32_1 : i32
    %6 = arith.index_cast %5 : i32 to index
    %c0 = arith.constant 0 : index
    %c0_2 = arith.constant 0 : index
    %7 = vector.load %arg13[%6, %c0, %c0_2] : memref<18x18x8xf32, #tpu.memory_space<vmem>>, vector<8x16x4xf32>
    %8 = vector.shape_cast %7 : vector<8x16x4xf32> to vector<128x4xf32>
    %c0_i32_3 = arith.constant 0 : i32
    %9 = arith.addi %3, %c0_i32_3 : i32
    %10 = arith.index_cast %9 : i32 to index
    %c1 = arith.constant 1 : index
    %c0_4 = arith.constant 0 : index
    %11 = vector.load %arg13[%10, %c1, %c0_4] : memref<18x18x8xf32, #tpu.memory_space<vmem>>, vector<8x16x4xf32>
    %12 = vector.shape_cast %11 : vector<8x16x4xf32> to vector<128x4xf32>
    %c0_i32_5 = arith.constant 0 : i32
    %13 = arith.addi %3, %c0_i32_5 : i32
    %14 = arith.index_cast %13 : i32 to index
    %c2 = arith.constant 2 : index
    %c0_6 = arith.constant 0 : index
    %15 = vector.load %arg13[%14, %c2, %c0_6] : memref<18x18x8xf32, #tpu.memory_space<vmem>>, vector<8x16x4xf32>
    %16 = vector.shape_cast %15 : vector<8x16x4xf32> to vector<128x4xf32>
    %c1_i32 = arith.constant 1 : i32
    %17 = arith.addi %3, %c1_i32 : i32
    %18 = arith.index_cast %17 : i32 to index
    %c0_7 = arith.constant 0 : index
    %c0_8 = arith.constant 0 : index
    %19 = vector.load %arg13[%18, %c0_7, %c0_8] : memref<18x18x8xf32, #tpu.memory_space<vmem>>, vector<8x16x4xf32>
    %20 = vector.shape_cast %19 : vector<8x16x4xf32> to vector<128x4xf32>
    %c1_i32_9 = arith.constant 1 : i32
    %21 = arith.addi %3, %c1_i32_9 : i32
    %22 = arith.index_cast %21 : i32 to index
    %c1_10 = arith.constant 1 : index
    %c0_11 = arith.constant 0 : index
    %23 = vector.load %arg13[%22, %c1_10, %c0_11] : memref<18x18x8xf32, #tpu.memory_space<vmem>>, vector<8x16x4xf32>
    %24 = vector.shape_cast %23 : vector<8x16x4xf32> to vector<128x4xf32>
    %c1_i32_12 = arith.constant 1 : i32
    %25 = arith.addi %3, %c1_i32_12 : i32
    %26 = arith.index_cast %25 : i32 to index
    %c2_13 = arith.constant 2 : index
    %c0_14 = arith.constant 0 : index
    %27 = vector.load %arg13[%26, %c2_13, %c0_14] : memref<18x18x8xf32, #tpu.memory_space<vmem>>, vector<8x16x4xf32>
    %28 = vector.shape_cast %27 : vector<8x16x4xf32> to vector<128x4xf32>
    %c2_i32 = arith.constant 2 : i32
    %29 = arith.addi %3, %c2_i32 : i32
    %30 = arith.index_cast %29 : i32 to index
    %c0_15 = arith.constant 0 : index
    %c0_16 = arith.constant 0 : index
    %31 = vector.load %arg13[%30, %c0_15, %c0_16] : memref<18x18x8xf32, #tpu.memory_space<vmem>>, vector<8x16x4xf32>
    %32 = vector.shape_cast %31 : vector<8x16x4xf32> to vector<128x4xf32>
    %c2_i32_17 = arith.constant 2 : i32
    %33 = arith.addi %3, %c2_i32_17 : i32
    %34 = arith.index_cast %33 : i32 to index
    %c1_18 = arith.constant 1 : index
    %c0_19 = arith.constant 0 : index
    %35 = vector.load %arg13[%34, %c1_18, %c0_19] : memref<18x18x8xf32, #tpu.memory_space<vmem>>, vector<8x16x4xf32>
    %36 = vector.shape_cast %35 : vector<8x16x4xf32> to vector<128x4xf32>
    %c2_i32_20 = arith.constant 2 : i32
    %37 = arith.addi %3, %c2_i32_20 : i32
    %38 = arith.index_cast %37 : i32 to index
    %c2_21 = arith.constant 2 : index
    %c0_22 = arith.constant 0 : index
    %39 = vector.load %arg13[%38, %c2_21, %c0_22] : memref<18x18x8xf32, #tpu.memory_space<vmem>>, vector<8x16x4xf32>
    %40 = vector.shape_cast %39 : vector<8x16x4xf32> to vector<128x4xf32>
    %41 = tpu.concatenate %8, %12, %16, %20, %24, %28, %32, %36, %40 in 1 : vector<128x4xf32>, vector<128x4xf32>, vector<128x4xf32>, vector<128x4xf32>, vector<128x4xf32>, vector<128x4xf32>, vector<128x4xf32>, vector<128x4xf32>, vector<128x4xf32> -> vector<128x36xf32>
    %42 = arith.truncf %41 : vector<128x36xf32> to vector<128x36xbf16>
    %c0_23 = arith.constant 0 : index
    %c0_24 = arith.constant 0 : index
    %c0_25 = arith.constant 0 : index
    %43 = vector.load %arg6[%c0_23, %c0_24, %c0_25] : memref<2x36x4xbf16, #tpu.memory_space<vmem>>, vector<1x36x4xbf16>
    %44 = vector.shape_cast %43 : vector<1x36x4xbf16> to vector<36x4xbf16>
    %cst_26 = arith.constant dense<0.000000e+00> : vector<128x4xf32>
    %45 = tpu.matmul %42, %44, %cst_26 {dimension_numbers = #tpu.dot_dimension_numbers<[1], [0], [0], [1], [0, 0, 1, 1], [], []>} : vector<128x36xbf16>, vector<36x4xbf16>, vector<128x4xf32> -> vector<128x4xf32>
    %c0_27 = arith.constant 0 : index
    %c0_28 = arith.constant 0 : index
    %c0_29 = arith.constant 0 : index
    %46 = vector.load %arg7[%c0_27, %c0_28, %c0_29] : memref<2x1x4xf32, #tpu.memory_space<vmem>>, vector<1x1x4xf32>
    %47 = vector.shape_cast %46 : vector<1x1x4xf32> to vector<1x4xf32>
    %48 = vector.broadcast %47 : vector<1x4xf32> to vector<128x4xf32>
    %49 = arith.mulf %45, %48 : vector<128x4xf32>
    %c0_30 = arith.constant 0 : index
    %c0_31 = arith.constant 0 : index
    %c0_32 = arith.constant 0 : index
    %50 = vector.load %arg8[%c0_30, %c0_31, %c0_32] : memref<2x1x4xf32, #tpu.memory_space<vmem>>, vector<1x1x4xf32>
    %51 = vector.shape_cast %50 : vector<1x1x4xf32> to vector<1x4xf32>
    %52 = vector.broadcast %51 : vector<1x4xf32> to vector<128x4xf32>
    %53 = arith.addf %49, %52 : vector<128x4xf32>
    %cst_33 = arith.constant 0.000000e+00 : f32
    %54 = vector.broadcast %cst_33 : f32 to vector<128x4xf32>
    %55 = arith.maximumf %53, %54 : vector<128x4xf32>
    %56 = arith.truncf %55 : vector<128x4xf32> to vector<128x4xbf16>
    %c0_34 = arith.constant 0 : index
    %c0_35 = arith.constant 0 : index
    %c0_36 = arith.constant 0 : index
    %57 = vector.load %arg9[%c0_34, %c0_35, %c0_36] : memref<2x4x8xbf16, #tpu.memory_space<vmem>>, vector<1x4x8xbf16>
    %58 = vector.shape_cast %57 : vector<1x4x8xbf16> to vector<4x8xbf16>
    %cst_37 = arith.constant dense<0.000000e+00> : vector<128x8xf32>
    %59 = tpu.matmul %56, %58, %cst_37 {dimension_numbers = #tpu.dot_dimension_numbers<[1], [0], [0], [1], [0, 0, 1, 1], [], []>} : vector<128x4xbf16>, vector<4x8xbf16>, vector<128x8xf32> -> vector<128x8xf32>
    %60 = arith.addf %4, %59 : vector<128x8xf32>
    %c0_i32_38 = arith.constant 0 : i32
    %61 = arith.addi %3, %c0_i32_38 : i32
    %62 = arith.index_cast %61 : i32 to index
    %c0_39 = arith.constant 0 : index
    %c4 = arith.constant 4 : index
    %63 = vector.load %arg13[%62, %c0_39, %c4] : memref<18x18x8xf32, #tpu.memory_space<vmem>>, vector<8x16x4xf32>
    %64 = vector.shape_cast %63 : vector<8x16x4xf32> to vector<128x4xf32>
    %c0_i32_40 = arith.constant 0 : i32
    %65 = arith.addi %3, %c0_i32_40 : i32
    %66 = arith.index_cast %65 : i32 to index
    %c1_41 = arith.constant 1 : index
    %c4_42 = arith.constant 4 : index
    %67 = vector.load %arg13[%66, %c1_41, %c4_42] : memref<18x18x8xf32, #tpu.memory_space<vmem>>, vector<8x16x4xf32>
    %68 = vector.shape_cast %67 : vector<8x16x4xf32> to vector<128x4xf32>
    %c0_i32_43 = arith.constant 0 : i32
    %69 = arith.addi %3, %c0_i32_43 : i32
    %70 = arith.index_cast %69 : i32 to index
    %c2_44 = arith.constant 2 : index
    %c4_45 = arith.constant 4 : index
    %71 = vector.load %arg13[%70, %c2_44, %c4_45] : memref<18x18x8xf32, #tpu.memory_space<vmem>>, vector<8x16x4xf32>
    %72 = vector.shape_cast %71 : vector<8x16x4xf32> to vector<128x4xf32>
    %c1_i32_46 = arith.constant 1 : i32
    %73 = arith.addi %3, %c1_i32_46 : i32
    %74 = arith.index_cast %73 : i32 to index
    %c0_47 = arith.constant 0 : index
    %c4_48 = arith.constant 4 : index
    %75 = vector.load %arg13[%74, %c0_47, %c4_48] : memref<18x18x8xf32, #tpu.memory_space<vmem>>, vector<8x16x4xf32>
    %76 = vector.shape_cast %75 : vector<8x16x4xf32> to vector<128x4xf32>
    %c1_i32_49 = arith.constant 1 : i32
    %77 = arith.addi %3, %c1_i32_49 : i32
    %78 = arith.index_cast %77 : i32 to index
    %c1_50 = arith.constant 1 : index
    %c4_51 = arith.constant 4 : index
    %79 = vector.load %arg13[%78, %c1_50, %c4_51] : memref<18x18x8xf32, #tpu.memory_space<vmem>>, vector<8x16x4xf32>
    %80 = vector.shape_cast %79 : vector<8x16x4xf32> to vector<128x4xf32>
    %c1_i32_52 = arith.constant 1 : i32
    %81 = arith.addi %3, %c1_i32_52 : i32
    %82 = arith.index_cast %81 : i32 to index
    %c2_53 = arith.constant 2 : index
    %c4_54 = arith.constant 4 : index
    %83 = vector.load %arg13[%82, %c2_53, %c4_54] : memref<18x18x8xf32, #tpu.memory_space<vmem>>, vector<8x16x4xf32>
    %84 = vector.shape_cast %83 : vector<8x16x4xf32> to vector<128x4xf32>
    %c2_i32_55 = arith.constant 2 : i32
    %85 = arith.addi %3, %c2_i32_55 : i32
    %86 = arith.index_cast %85 : i32 to index
    %c0_56 = arith.constant 0 : index
    %c4_57 = arith.constant 4 : index
    %87 = vector.load %arg13[%86, %c0_56, %c4_57] : memref<18x18x8xf32, #tpu.memory_space<vmem>>, vector<8x16x4xf32>
    %88 = vector.shape_cast %87 : vector<8x16x4xf32> to vector<128x4xf32>
    %c2_i32_58 = arith.constant 2 : i32
    %89 = arith.addi %3, %c2_i32_58 : i32
    %90 = arith.index_cast %89 : i32 to index
    %c1_59 = arith.constant 1 : index
    %c4_60 = arith.constant 4 : index
    %91 = vector.load %arg13[%90, %c1_59, %c4_60] : memref<18x18x8xf32, #tpu.memory_space<vmem>>, vector<8x16x4xf32>
    %92 = vector.shape_cast %91 : vector<8x16x4xf32> to vector<128x4xf32>
    %c2_i32_61 = arith.constant 2 : i32
    %93 = arith.addi %3, %c2_i32_61 : i32
    %94 = arith.index_cast %93 : i32 to index
    %c2_62 = arith.constant 2 : index
    %c4_63 = arith.constant 4 : index
    %95 = vector.load %arg13[%94, %c2_62, %c4_63] : memref<18x18x8xf32, #tpu.memory_space<vmem>>, vector<8x16x4xf32>
    %96 = vector.shape_cast %95 : vector<8x16x4xf32> to vector<128x4xf32>
    %97 = tpu.concatenate %64, %68, %72, %76, %80, %84, %88, %92, %96 in 1 : vector<128x4xf32>, vector<128x4xf32>, vector<128x4xf32>, vector<128x4xf32>, vector<128x4xf32>, vector<128x4xf32>, vector<128x4xf32>, vector<128x4xf32>, vector<128x4xf32> -> vector<128x36xf32>
    %98 = arith.truncf %97 : vector<128x36xf32> to vector<128x36xbf16>
    %c1_64 = arith.constant 1 : index
    %c0_65 = arith.constant 0 : index
    %c0_66 = arith.constant 0 : index
    %99 = vector.load %arg6[%c1_64, %c0_65, %c0_66] : memref<2x36x4xbf16, #tpu.memory_space<vmem>>, vector<1x36x4xbf16>
    %100 = vector.shape_cast %99 : vector<1x36x4xbf16> to vector<36x4xbf16>
    %cst_67 = arith.constant dense<0.000000e+00> : vector<128x4xf32>
    %101 = tpu.matmul %98, %100, %cst_67 {dimension_numbers = #tpu.dot_dimension_numbers<[1], [0], [0], [1], [0, 0, 1, 1], [], []>} : vector<128x36xbf16>, vector<36x4xbf16>, vector<128x4xf32> -> vector<128x4xf32>
    %c1_68 = arith.constant 1 : index
    %c0_69 = arith.constant 0 : index
    %c0_70 = arith.constant 0 : index
    %102 = vector.load %arg7[%c1_68, %c0_69, %c0_70] : memref<2x1x4xf32, #tpu.memory_space<vmem>>, vector<1x1x4xf32>
    %103 = vector.shape_cast %102 : vector<1x1x4xf32> to vector<1x4xf32>
    %104 = vector.broadcast %103 : vector<1x4xf32> to vector<128x4xf32>
    %105 = arith.mulf %101, %104 : vector<128x4xf32>
    %c1_71 = arith.constant 1 : index
    %c0_72 = arith.constant 0 : index
    %c0_73 = arith.constant 0 : index
    %106 = vector.load %arg8[%c1_71, %c0_72, %c0_73] : memref<2x1x4xf32, #tpu.memory_space<vmem>>, vector<1x1x4xf32>
    %107 = vector.shape_cast %106 : vector<1x1x4xf32> to vector<1x4xf32>
    %108 = vector.broadcast %107 : vector<1x4xf32> to vector<128x4xf32>
    %109 = arith.addf %105, %108 : vector<128x4xf32>
    %cst_74 = arith.constant 0.000000e+00 : f32
    %110 = vector.broadcast %cst_74 : f32 to vector<128x4xf32>
    %111 = arith.maximumf %109, %110 : vector<128x4xf32>
    %112 = arith.truncf %111 : vector<128x4xf32> to vector<128x4xbf16>
    %c1_75 = arith.constant 1 : index
    %c0_76 = arith.constant 0 : index
    %c0_77 = arith.constant 0 : index
    %113 = vector.load %arg9[%c1_75, %c0_76, %c0_77] : memref<2x4x8xbf16, #tpu.memory_space<vmem>>, vector<1x4x8xbf16>
    %114 = vector.shape_cast %113 : vector<1x4x8xbf16> to vector<4x8xbf16>
    %cst_78 = arith.constant dense<0.000000e+00> : vector<128x8xf32>
    %115 = tpu.matmul %112, %114, %cst_78 {dimension_numbers = #tpu.dot_dimension_numbers<[1], [0], [0], [1], [0, 0, 1, 1], [], []>} : vector<128x4xbf16>, vector<4x8xbf16>, vector<128x8xf32> -> vector<128x8xf32>
    %116 = arith.addf %60, %115 : vector<128x8xf32>
    %c0_79 = arith.constant 0 : index
    %117 = arith.index_cast %3 : i32 to index
    %c0_80 = arith.constant 0 : index
    %c0_81 = arith.constant 0 : index
    %118 = vector.load %arg2[%c0_79, %117, %c0_80, %c0_81] : memref<1x16x16x8xf32, #tpu.memory_space<vmem>>, vector<1x8x16x8xf32>
    %119 = vector.shape_cast %118 : vector<1x8x16x8xf32> to vector<8x16x8xf32>
    %120 = vector.shape_cast %119 : vector<8x16x8xf32> to vector<128x8xf32>
    %c0_82 = arith.constant 0 : index
    %c0_83 = arith.constant 0 : index
    %121 = vector.load %arg10[%c0_82, %c0_83] : memref<1x8xf32, #tpu.memory_space<vmem>>, vector<1x8xf32>
    %122 = vector.broadcast %121 : vector<1x8xf32> to vector<128x8xf32>
    %123 = arith.mulf %116, %122 : vector<128x8xf32>
    %c0_84 = arith.constant 0 : index
    %c0_85 = arith.constant 0 : index
    %124 = vector.load %arg11[%c0_84, %c0_85] : memref<1x8xf32, #tpu.memory_space<vmem>>, vector<1x8xf32>
    %125 = vector.broadcast %124 : vector<1x8xf32> to vector<128x8xf32>
    %126 = arith.addf %123, %125 : vector<128x8xf32>
    %127 = arith.addf %126, %120 : vector<128x8xf32>
    %cst_86 = arith.constant 0.000000e+00 : f32
    %128 = vector.broadcast %cst_86 : f32 to vector<128x8xf32>
    %129 = arith.maximumf %127, %128 : vector<128x8xf32>
    %130 = vector.shape_cast %129 : vector<128x8xf32> to vector<1x8x16x8xf32>
    %c0_87 = arith.constant 0 : index
    %c0_88 = arith.constant 0 : index
    %c0_89 = arith.constant 0 : index
    %c0_90 = arith.constant 0 : index
    %131 = vector.load %arg12[%c0_87, %c0_88, %c0_89, %c0_90] : memref<1x8x16x8xf32, #tpu.memory_space<vmem>>, vector<1x8x16x8xf32>
    tpu.vector_store %arg12[%c0_87, %c0_88, %c0_89, %c0_90], %130 {strides = array<i32>} : memref<1x8x16x8xf32, #tpu.memory_space<vmem>>, vector<1x8x16x8xf32>,
    return
  }
  func.func @transform_0(%arg0: i32, %arg1: i32) -> (i32, i32, i32, i32) {
    %c0_i32 = arith.constant 0 : i32
    %c0_i32_0 = arith.constant 0 : i32
    %c0_i32_1 = arith.constant 0 : i32
    %c0_i32_2 = arith.constant 0 : i32
    return %arg0, %c0_i32, %c0_i32_0, %c0_i32_1 : i32, i32, i32, i32
  }
  func.func @transform_1(%arg0: i32, %arg1: i32) -> (i32, i32) {
    %c0_i32 = arith.constant 0 : i32
    %c0_i32_0 = arith.constant 0 : i32
    %c0_i32_1 = arith.constant 0 : i32
    return %c0_i32, %c0_i32_0 : i32, i32
  }
  func.func @transform_2(%arg0: i32, %arg1: i32) -> (i32, i32) {
    %c0_i32 = arith.constant 0 : i32
    %c0_i32_0 = arith.constant 0 : i32
    %c0_i32_1 = arith.constant 0 : i32
    return %c0_i32, %c0_i32_0 : i32, i32
  }
  func.func @transform_3(%arg0: i32, %arg1: i32) -> (i32, i32) {
    %c0_i32 = arith.constant 0 : i32
    %c0_i32_0 = arith.constant 0 : i32
    %c0_i32_1 = arith.constant 0 : i32
    return %c0_i32, %c0_i32_0 : i32, i32
  }
  func.func @transform_4(%arg0: i32, %arg1: i32) -> (i32, i32, i32) {
    %c0_i32 = arith.constant 0 : i32
    %c0_i32_0 = arith.constant 0 : i32
    %c0_i32_1 = arith.constant 0 : i32
    %c0_i32_2 = arith.constant 0 : i32
    return %c0_i32, %c0_i32_0, %c0_i32_1 : i32, i32, i32
  }
  func.func @transform_5(%arg0: i32, %arg1: i32) -> (i32, i32, i32) {
    %c0_i32 = arith.constant 0 : i32
    %c0_i32_0 = arith.constant 0 : i32
    %c0_i32_1 = arith.constant 0 : i32
    %c0_i32_2 = arith.constant 0 : i32
    return %c0_i32, %c0_i32_0, %c0_i32_1 : i32, i32, i32
  }
  func.func @transform_6(%arg0: i32, %arg1: i32) -> (i32, i32, i32) {
    %c0_i32 = arith.constant 0 : i32
    %c0_i32_0 = arith.constant 0 : i32
    %c0_i32_1 = arith.constant 0 : i32
    %c0_i32_2 = arith.constant 0 : i32
    return %c0_i32, %c0_i32_0, %c0_i32_1 : i32, i32, i32
  }
  func.func @transform_7(%arg0: i32, %arg1: i32) -> (i32, i32, i32) {
    %c0_i32 = arith.constant 0 : i32
    %c0_i32_0 = arith.constant 0 : i32
    %c0_i32_1 = arith.constant 0 : i32
    %c0_i32_2 = arith.constant 0 : i32
    return %c0_i32, %c0_i32_0, %c0_i32_1 : i32, i32, i32
  }
  func.func @transform_8(%arg0: i32, %arg1: i32) -> (i32, i32) {
    %c0_i32 = arith.constant 0 : i32
    %c0_i32_0 = arith.constant 0 : i32
    %c0_i32_1 = arith.constant 0 : i32
    return %c0_i32, %c0_i32_0 : i32, i32
  }
  func.func @transform_9(%arg0: i32, %arg1: i32) -> (i32, i32) {
    %c0_i32 = arith.constant 0 : i32
    %c0_i32_0 = arith.constant 0 : i32
    %c0_i32_1 = arith.constant 0 : i32
    return %c0_i32, %c0_i32_0 : i32, i32
  }
  func.func @transform_10(%arg0: i32, %arg1: i32) -> (i32, i32, i32, i32) {
    %c0_i32 = arith.constant 0 : i32
    %c0_i32_0 = arith.constant 0 : i32
    %c0_i32_1 = arith.constant 0 : i32
    return %arg0, %arg1, %c0_i32, %c0_i32_0 : i32, i32, i32, i32
  }
}

</mosaic_0001>

<bundles_post_ra>
// kernel: tpu_custom_call.1
= control target key start
LH: loop header
LB: loop body
LE: loop exit
PB: predicated region body
PF: predicated region fallthrough
CT: control target
= control target key end

     0   :  { %s4279_s13 = smov 0   ;;  %s4281_s14 = smov 0   ;;  %s5822_s0 = inlined_call_operand.vmem [shape: f32[2,16,16,8], index: 0, kind: input, shape index: {}]   ;;  %s5823_s1 = inlined_call_operand.vmem [shape: bf16[8,8], index: 1, kind: input, shape index: {}]   ;;  %s5824_s2 = inlined_call_operand.vmem [shape: f32[1,8], index: 2, kind: input, shape index: {}]   ;;  %s5825_s3 = inlined_call_operand.vmem [shape: f32[1,8], index: 3, kind: input, shape index: {}]   ;;  %s5826_s4 = inlined_call_operand.vmem [shape: bf16[2,36,4], index: 4, kind: input, shape index: {}]   ;;  %s5827_s5 = inlined_call_operand.vmem [shape: f32[2,1,4], index: 5, kind: input, shape index: {}]   ;;  %s5828_s6 = inlined_call_operand.vmem [shape: f32[2,1,4], index: 6, kind: input, shape index: {}]   ;;  %s5829_s7 = inlined_call_operand.vmem [shape: bf16[2,4,8], index: 7, kind: input, shape index: {}]   ;;  %s5830_s8 = inlined_call_operand.vmem [shape: f32[1,8], index: 8, kind: input, shape index: {}]   ;;  %s5831_s9 = inlined_call_operand.vmem [shape: f32[1,8], index: 9, kind: input, shape index: {}]   ;;  %s5832_s10 = inlined_call_operand.vmem [shape: f32[2,16,16,8], index: 10, kind: output, shape index: {}]  }
   0x1   :  { %s4283_s15 = smov 0   ;;  %s4285_s16 = smov 0  }
   0x2   :  { %s4287_s17 = smov 0  }
   0x3 LB: > { %s29_s18 = sadd.s32 1, %s4204_s15  ;;  %s32_s19 = sadd.s32 1, %s4208_s16  ;;  %s4212_s17 = sphi %s4287_s17, %s20_s17   ;;  %s4208_s16 = sphi %s4285_s16, %s5844_s16   ;;  %s4204_s15 = sphi %s4283_s15, %s5843_s15   ;;  %s4200_s14 = sphi %s4281_s14, %s5842_s14   ;;  %s4196_s13 = sphi %s4279_s13, %s5841_s13  }
   0x4   : > { %p30_p0 = scmp.ge.s32.totalorder %s29_s18, 2  ;;  %p3098_p1 = scmp.ge.s32.totalorder %s4212_s17, 1 }
   0x5   : > { %p326_p2 = scmp.lt.s32.totalorder %s4212_s17, 5 }
   0x6   : > { %s5846_s18 = smov (%p30_p0, %s29_s18), 0  ;;  %s5848_s19 = smov (!%p30_p0, %s32_s19), %s4208_s16 }
   0x7   : > { %p327_p3 = pnand %p3098_p1, %p326_p2  ;;  %p34_p4 = scmp.ge.s32.totalorder %s5848_s19, 2 }
   0x8   : > { %p369_p5 = scmp.lt.s32.totalorder (!%p327_p3), %s4200_s14, 1  ;;  %s3101_s20 = sshll.u32 (!%p327_p3), %s4196_s13, 3 }
   0x9   : > { %s5850_s19 = smov (%p34_p4, %s5848_s19), 0  ;;  %330 = sbr.rel (%p327_p3) target bundleno = 1058 (0x422), region = 60 }
   0xa   : > { %5837 = sst [smem:[#allocation3_spill]] %s5850_s19  ;;  %p377_p6 = scmp.lt.s32.totalorder (!%p327_p3), %s3101_s20, 15 }
   0xb   : > { %p3105_p7 = scmp.ne.s32.totalorder (!%p327_p3), %s4196_s13, 0 }
   0xe   : > { %s5852_s14 = smov (!%p369_p5, %s4200_s14), 1  ;;  %s5854_s20 = smov (!%p377_p6, %s3101_s20), 15 }
   0xf   : > { %s3281_s21 = sshll.u32 %s5852_s14, 8  ;;  %s3103_s22 = sshll.u32 %s5852_s14, 5 }
  0x10   : > { %s4315_s25 = scalar_lea.vmem %s5822_s0, %s3281_s21  ;;  %s3102_s26 = sshll.u32 %s5854_s20, 1 }
  0x11   : > { %s381_s27 = sadd.s32 %s3103_s22, %s3102_s26  ;;  %389 = sbr.rel (%p3105_p7) target bundleno = 258 (0x102), region = 64 }
  0x12   : > { %s3104_s28 = sshll.u32 %s381_s27, 3 }
  0x13   : > { %s4320_s11 = scalar_lea.vmem %s5832_s10, %s3104_s28 }
  0x16   : > { %v494_v0 = vld [vmem:[%s5823_s1] sm:$0xf]  ;;  %vm543_vm0 = vcmask 1043456   ;;  %vm390_vm1 = vcmask 64512   ;;  %v447_v2 = vld [vmem:[%s4315_s25 + $0x8] sm:$0xff]  ;;  %v448_v7 = vld [vmem:[%s4315_s25 + $0x10] sm:$0xff] }
  0x17   : > { %v446_v1 = vld [vmem:[%s4315_s25] sm:$0xff]  ;;  %3456 = vmatprep.subr.msk.bf16.mxu0 %vm543_vm0, %v494_v0  ;;  %3457 = vmatprep.subr.msk.bf16.mxu1 %vm543_vm0, %v494_v0  ;;  %v545_v3 = vsel %vm543_vm0, %v494_v0, 0  ;;  %v463_v6 = vld [vmem:[%s4315_s25 + $0x88] sm:$0xff]  ;;  %v449_v9 = vld [vmem:[%s4315_s25 + $0x18] sm:$0xff]  ;;  %v4214_v12 = vmov 0.0   ;;  %vm393_vm2 = vcmask 58368  }
  0x18   : > { %v478_v4 = vpack.c.bf16 %v447_v2, %v446_v1  ;;  %v462_v5 = vld [vmem:[%s4315_s25 + $0x80] sm:$0xff]  ;;  %3341 = vmatpush3.bf16.msra.mxu0 %v545_v3  ;;  %3455 = vmatpush3.bf16.msra.mxu1 %v545_v3  ;;  %v464_v10 = vld [vmem:[%s4315_s25 + $0x90] sm:$0xff]  ;;  %v465_v11 = vld [vmem:[%s4315_s25 + $0x98] sm:$0xff]  ;;  %391 = vst.msk [vmem:[#allocation2] sm:$0xff] %vm390_vm1, %v4214_v12  ;;  %v479_v13 = vpack.c.bf16 %v449_v9, %v448_v7 }
  0x19   : > { %v486_v8 = vpack.c.bf16 %v463_v6, %v462_v5  ;;  %392 = vst.msk [vmem:[#allocation2 + $0x8] sm:$0xff] %vm390_vm1, %v4214_v12  ;;  %398 = vst.msk [vmem:[#allocation2 + $0x30] sm:$0xff] %vm390_vm1, %v4214_v12  ;;  %v487_v14 = vpack.c.bf16 %v465_v11, %v464_v10  ;;  %v450_v15 = vld [vmem:[%s4315_s25 + $0x20] sm:$0xff]  ;;  %v451_v16 = vld [vmem:[%s4315_s25 + $0x28] sm:$0xff] }
  0x1a   : > { %399 = vst.msk [vmem:[#allocation2 + $0x38] sm:$0xff] %vm390_vm1, %v4214_v12  ;;  %443 = vst.msk [vmem:[#allocation2 + $0x198] sm:$0xff] %vm390_vm1, %v4214_v12  ;;  %3342 = vmatprep.mubr.msk.bf16.mxu0 %vm390_vm1, %v478_v4  ;;  %v466_v17 = vld [vmem:[%s4315_s25 + $0xa0] sm:$0xff]  ;;  %v480_v18 = vpack.c.bf16 %v451_v16, %v450_v15  ;;  %v467_v19 = vld [vmem:[%s4315_s25 + $0xa8] sm:$0xff] }
  0x1b   : > { %444 = vst.msk [vmem:[#allocation2 + $0x1a0] sm:$0xff] %vm390_vm1, %v4214_v12  ;;  %395 = vst.msk [vmem:[#allocation2 + $0x18] sm:$0xff] %vm390_vm1, %v4214_v12  ;;  %3358 = vmatprep.mubr.msk.bf16.mxu1 %vm390_vm1, %v486_v8  ;;  %3343 = vmatmul.mubr.msk.bf16.vlgmr.msra.gmra.mxu0 %vm390_vm1, %v479_v13  ;;  %v488_v20 = vpack.c.bf16 %v467_v19, %v466_v17  ;;  %v452_v21 = vld [vmem:[%s4315_s25 + $0x30] sm:$0xff]  ;;  %v453_v22 = vld [vmem:[%s4315_s25 + $0x38] sm:$0xff] }
  0x1c   : > { %396 = vst.msk [vmem:[#allocation2 + $0x20] sm:$0xff] %vm390_vm1, %v4214_v12  ;;  %401 = vst.msk [vmem:[#allocation2 + $0x48] sm:$0xff] %vm390_vm1, %v4214_v12  ;;  %3359 = vmatmul.mubr.msk.bf16.vlgmr.msra.gmra.mxu1 %vm390_vm1, %v487_v14  ;;  %3346 = vmatprep.mubr.msk.bf16.mxu0 %vm390_vm1, %v480_v18  ;;  %v468_v23 = vld [vmem:[%s4315_s25 + $0xb0] sm:$0xff]  ;;  %v469_v24 = vld [vmem:[%s4315_s25 + $0xb8] sm:$0xff]  ;;  %v481_v29 = vpack.c.bf16 %v453_v22, %v452_v21 }
  0x1d   : > { %402 = vst.msk [vmem:[#allocation2 + $0x50] sm:$0xff] %vm390_vm1, %v4214_v12  ;;  %404 = vst.msk [vmem:[#allocation2 + $0x60] sm:$0xff] %vm390_vm1, %v4214_v12  ;;  %v454_v25 = vld [vmem:[%s4315_s25 + $0x40] sm:$0xff]  ;;  %3362 = vmatprep.mubr.msk.bf16.mxu1 %vm390_vm1, %v488_v20  ;;  %v455_v26 = vld [vmem:[%s4315_s25 + $0x48] sm:$0xff]  ;;  %v489_v30 = vpack.c.bf16 %v469_v24, %v468_v23 }
  0x1e   : > { %405 = vst.msk [vmem:[#allocation2 + $0x68] sm:$0xff] %vm390_vm1, %v4214_v12  ;;  %407 = vst.msk [vmem:[#allocation2 + $0x78] sm:$0xff] %vm390_vm1, %v4214_v12  ;;  %v470_v27 = vld [vmem:[%s4315_s25 + $0xc0] sm:$0xff]  ;;  %v471_v28 = vld [vmem:[%s4315_s25 + $0xc8] sm:$0xff]  ;;  %v482_v31 = vpack.c.bf16 %v455_v26, %v454_v25 }
  0x1f   : > { %408 = vst.msk [vmem:[#allocation2 + $0x80] sm:$0xff] %vm390_vm1, %v4214_v12  ;;  %410 = vst.msk [vmem:[#allocation2 + $0x90] sm:$0xff] %vm390_vm1, %v4214_v12  ;;  %v490_v32 = vpack.c.bf16 %v471_v28, %v470_v27  ;;  %v456_v33 = vld [vmem:[%s4315_s25 + $0x50] sm:$0xff]  ;;  %v457_v34 = vld [vmem:[%s4315_s25 + $0x58] sm:$0xff] }
  0x20   : > { %411 = vst.msk [vmem:[#allocation2 + $0x98] sm:$0xff] %vm390_vm1, %v4214_v12  ;;  %413 = vst.msk [vmem:[#allocation2 + $0xa8] sm:$0xff] %vm390_vm1, %v4214_v12  ;;  %v472_v35 = vld [vmem:[%s4315_s25 + $0xd0] sm:$0xff]  ;;  %v473_v36 = vld [vmem:[%s4315_s25 + $0xd8] sm:$0xff]  ;;  %v483_v41 = vpack.c.bf16 %v457_v34, %v456_v33 }
  0x21   : > { %414 = vst.msk [vmem:[#allocation2 + $0xb0] sm:$0xff] %vm390_vm1, %v4214_v12  ;;  %416 = vst.msk [vmem:[#allocation2 + $0xc0] sm:$0xff] %vm390_vm1, %v4214_v12  ;;  %v458_v37 = vld [vmem:[%s4315_s25 + $0x60] sm:$0xff]  ;;  %v459_v38 = vld [vmem:[%s4315_s25 + $0x68] sm:$0xff]  ;;  %v491_v42 = vpack.c.bf16 %v473_v36, %v472_v35 }
  0x22   : > { %417 = vst.msk [vmem:[#allocation2 + $0xc8] sm:$0xff] %vm390_vm1, %v4214_v12  ;;  %419 = vst.msk [vmem:[#allocation2 + $0xd8] sm:$0xff] %vm390_vm1, %v4214_v12  ;;  %v474_v39 = vld [vmem:[%s4315_s25 + $0xe0] sm:$0xff]  ;;  %v475_v40 = vld [vmem:[%s4315_s25 + $0xe8] sm:$0xff]  ;;  %v484_v43 = vpack.c.bf16 %v459_v38, %v458_v37 }
  0x23   : > { %420 = vst.msk [vmem:[#allocation2 + $0xe0] sm:$0xff] %vm390_vm1, %v4214_v12  ;;  %422 = vst.msk [vmem:[#allocation2 + $0xf0] sm:$0xff] %vm390_vm1, %v4214_v12  ;;  %3347 = vmatmul.mubr.msk.bf16.gmra.mxu0 %vm390_vm1, %v481_v29  ;;  %v492_v44 = vpack.c.bf16 %v475_v40, %v474_v39  ;;  %v460_v45 = vld [vmem:[%s4315_s25 + $0x70] sm:$0xff]  ;;  %v461_v46 = vld [vmem:[%s4315_s25 + $0x78] sm:$0xff] }
  0x24   : > { %423 = vst.msk [vmem:[#allocation2 + $0xf8] sm:$0xff] %vm390_vm1, %v4214_v12  ;;  %425 = vst.msk [vmem:[#allocation2 + $0x108] sm:$0xff] %vm390_vm1, %v4214_v12  ;;  %3363 = vmatmul.mubr.msk.bf16.gmra.mxu1 %vm390_vm1, %v489_v30  ;;  %3350 = vmatprep.mubr.msk.bf16.mxu0 %vm390_vm1, %v482_v31  ;;  %v476_v47 = vld [vmem:[%s4315_s25 + $0xf0] sm:$0xff]  ;;  %v477_v48 = vld [vmem:[%s4315_s25 + $0xf8] sm:$0xff]  ;;  %v485_v49 = vpack.c.bf16 %v461_v46, %v460_v45 }
  0x25   : > { %426 = vst.msk [vmem:[#allocation2 + $0x110] sm:$0xff] %vm390_vm1, %v4214_v12  ;;  %428 = vst.msk [vmem:[#allocation2 + $0x120] sm:$0xff] %vm390_vm1, %v4214_v12  ;;  %3366 = vmatprep.mubr.msk.bf16.mxu1 %vm390_vm1, %v490_v32  ;;  %v493_v50 = vpack.c.bf16 %v477_v48, %v476_v47  ;;  %v4485_v51 = vld [vmem:[%s5824_s2] ss:$0 sm:$0xff] }
  0x26   : > { %429 = vst.msk [vmem:[#allocation2 + $0x128] sm:$0xff] %vm390_vm1, %v4214_v12  ;;  %431 = vst.msk [vmem:[#allocation2 + $0x138] sm:$0xff] %vm390_vm1, %v4214_v12  ;;  %v4490_v53 = vld [vmem:[%s5825_s3] ss:$0 sm:$0xff] }
  0x27   : > { %432 = vst.msk [vmem:[#allocation2 + $0x140] sm:$0xff] %vm390_vm1, %v4214_v12  ;;  %434 = vst.msk [vmem:[#allocation2 + $0x150] sm:$0xff] %vm390_vm1, %v4214_v12 }
  0x28   : > { %435 = vst.msk [vmem:[#allocation2 + $0x158] sm:$0xff] %vm390_vm1, %v4214_v12  ;;  %437 = vst.msk [vmem:[#allocation2 + $0x168] sm:$0xff] %vm390_vm1, %v4214_v12 }
  0x29   : > { %438 = vst.msk [vmem:[#allocation2 + $0x170] sm:$0xff] %vm390_vm1, %v4214_v12  ;;  %440 = vst.msk [vmem:[#allocation2 + $0x180] sm:$0xff] %vm390_vm1, %v4214_v12 }
  0x2a   : > { %441 = vst.msk [vmem:[#allocation2 + $0x188] sm:$0xff] %vm390_vm1, %v4214_v12 }
  0x2b   : > { %3351 = vmatmul.mubr.msk.bf16.gmra.mxu0 %vm390_vm1, %v483_v41  ;;  %394 = vst.msk [vmem:[#allocation2 + $0x10] sm:$0x3] %vm393_vm2, %v4214_v12  ;;  %400 = vst.msk [vmem:[#allocation2 + $0x40] sm:$0x3] %vm393_vm2, %v4214_v12 }
  0x2c   : > { %3367 = vmatmul.mubr.msk.bf16.gmra.mxu1 %vm390_vm1, %v491_v42  ;;  %3354 = vmatprep.mubr.msk.bf16.mxu0 %vm390_vm1, %v484_v43  ;;  %445 = vst.msk [vmem:[#allocation2 + $0x1a8] sm:$0x3] %vm393_vm2, %v4214_v12  ;;  %397 = vst.msk [vmem:[#allocation2 + $0x28] sm:$0x3] %vm393_vm2, %v4214_v12 }
  0x2d   : > { %3370 = vmatprep.mubr.msk.bf16.mxu1 %vm390_vm1, %v492_v44  ;;  %403 = vst.msk [vmem:[#allocation2 + $0x58] sm:$0x3] %vm393_vm2, %v4214_v12  ;;  %406 = vst.msk [vmem:[#allocation2 + $0x70] sm:$0x3] %vm393_vm2, %v4214_v12 }
  0x2e   : > { %409 = vst.msk [vmem:[#allocation2 + $0x88] sm:$0x3] %vm393_vm2, %v4214_v12  ;;  %412 = vst.msk [vmem:[#allocation2 + $0xa0] sm:$0x3] %vm393_vm2, %v4214_v12 }
  0x2f   : > { %415 = vst.msk [vmem:[#allocation2 + $0xb8] sm:$0x3] %vm393_vm2, %v4214_v12  ;;  %418 = vst.msk [vmem:[#allocation2 + $0xd0] sm:$0x3] %vm393_vm2, %v4214_v12 }
  0x30   : > { %421 = vst.msk [vmem:[#allocation2 + $0xe8] sm:$0x3] %vm393_vm2, %v4214_v12  ;;  %424 = vst.msk [vmem:[#allocation2 + $0x100] sm:$0x3] %vm393_vm2, %v4214_v12 }
  0x31   : > { %427 = vst.msk [vmem:[#allocation2 + $0x118] sm:$0x3] %vm393_vm2, %v4214_v12  ;;  %430 = vst.msk [vmem:[#allocation2 + $0x130] sm:$0x3] %vm393_vm2, %v4214_v12 }
  0x32   : > { %433 = vst.msk [vmem:[#allocation2 + $0x148] sm:$0x3] %vm393_vm2, %v4214_v12  ;;  %436 = vst.msk [vmem:[#allocation2 + $0x160] sm:$0x3] %vm393_vm2, %v4214_v12 }
  0x33   : > { %3355 = vmatmul.mubr.msk.bf16.gmra.mxu0 %vm390_vm1, %v485_v49  ;;  %439 = vst.msk [vmem:[#allocation2 + $0x178] sm:$0x3] %vm393_vm2, %v4214_v12  ;;  %442 = vst.msk [vmem:[#allocation2 + $0x190] sm:$0x3] %vm393_vm2, %v4214_v12 }
  0x34   : > { %3371 = vmatmul.mubr.msk.bf16.gmra.mxu1 %vm390_vm1, %v493_v50 }
  0xdb   : > { %v3344_v52 = vpop.f32.mrf.mxu0 }
  0xdc   : > { %v3360_v54 = vpop.f32.mrf.mxu1  ;;  %v717_v55 = vmul.f32 %v3344_v52, %v4485_v51 }
  0xdd   : > { %v733_v56 = vmul.f32 %v3360_v54, %v4485_v51  ;;  %v581_v57 = vpop.f32.mrf.mxu0 }
  0xde   : > { %v645_v58 = vpop.f32.mrf.mxu1  ;;  %v756_v59 = vadd.f32 %v4490_v53, %v717_v55  ;;  %v715_v61 = vmul.f32 %v4485_v51, %v581_v57 }
  0xdf   : > { %v772_v60 = vadd.f32 %v4490_v53, %v733_v56  ;;  %v731_v62 = vmul.f32 %v4485_v51, %v645_v58  ;;  %v3345_v63 = vpop.f32.mrf.mxu0 }
  0xe0   : > { %v3361_v0 = vpop.f32.mrf.mxu1  ;;  %v788_v1 = vmax.f32 %v756_v59, 0.0  ;;  %v754_v3 = vadd.f32 %v4490_v53, %v715_v61  ;;  %v718_v5 = vmul.f32 %v3345_v63, %v4485_v51 }
  0xe1   : > { %v804_v2 = vmax.f32 %v772_v60, 0.0  ;;  %v770_v4 = vadd.f32 %v4490_v53, %v731_v62  ;;  %v734_v6 = vmul.f32 %v3361_v0, %v4485_v51  ;;  %v584_v7 = vpop.f32.mrf.mxu0 }
  0xe2   : > { %v648_v8 = vpop.f32.mrf.mxu1  ;;  %821 = vst.msk [vmem:[#allocation2 + $0x31] sm:$0xff] %vm390_vm1, %v788_v1  ;;  %v786_v9 = vmax.f32 %v754_v3, 0.0  ;;  %v716_v11 = vmul.f32 %v4485_v51, %v584_v7  ;;  %v757_v13 = vadd.f32 %v4490_v53, %v718_v5 }
  0xe3   : > { %837 = vst.msk [vmem:[#allocation2 + $0xf1] sm:$0xff] %vm390_vm1, %v804_v2  ;;  %v802_v10 = vmax.f32 %v770_v4, 0.0  ;;  %v732_v12 = vmul.f32 %v4485_v51, %v648_v8  ;;  %v773_v14 = vadd.f32 %v4490_v53, %v734_v6  ;;  %v3348_v15 = vpop.f32.mrf.mxu0 }
  0xe4   : > { %v3364_v16 = vpop.f32.mrf.mxu1  ;;  %819 = vst.msk [vmem:[#allocation2 + $0x19] sm:$0xff] %vm390_vm1, %v786_v9  ;;  %v755_v17 = vadd.f32 %v4490_v53, %v716_v11  ;;  %v721_v19 = vmul.f32 %v3348_v15, %v4485_v51  ;;  %v789_v21 = vmax.f32 %v757_v13, 0.0 }
  0xe5   : > { %835 = vst.msk [vmem:[#allocation2 + $0xd9] sm:$0xff] %vm390_vm1, %v802_v10  ;;  %v771_v18 = vadd.f32 %v4490_v53, %v732_v12  ;;  %v737_v20 = vmul.f32 %v3364_v16, %v4485_v51  ;;  %v805_v22 = vmax.f32 %v773_v14, 0.0  ;;  %v597_v23 = vpop.f32.mrf.mxu0 }
  0xe6   : > { %v661_v24 = vpop.f32.mrf.mxu1  ;;  %v787_v25 = vmax.f32 %v755_v17, 0.0  ;;  %v760_v27 = vadd.f32 %v4490_v53, %v721_v19  ;;  %822 = vst.msk [vmem:[#allocation2 + $0x39] sm:$0xff] %vm390_vm1, %v789_v21  ;;  %v719_v29 = vmul.f32 %v4485_v51, %v597_v23 }
  0xe7   : > { %v803_v26 = vmax.f32 %v771_v18, 0.0  ;;  %v776_v28 = vadd.f32 %v4490_v53, %v737_v20  ;;  %838 = vst.msk [vmem:[#allocation2 + $0xf9] sm:$0xff] %vm390_vm1, %v805_v22  ;;  %v735_v30 = vmul.f32 %v4485_v51, %v661_v24  ;;  %v3349_v31 = vpop.f32.mrf.mxu0 }
  0xe8   : > { %v3365_v32 = vpop.f32.mrf.mxu1  ;;  %820 = vst.msk [vmem:[#allocation2 + $0x21] sm:$0xff] %vm390_vm1, %v787_v25  ;;  %v792_v33 = vmax.f32 %v760_v27, 0.0  ;;  %v722_v35 = vmul.f32 %v3349_v31, %v4485_v51  ;;  %v758_v37 = vadd.f32 %v4490_v53, %v719_v29 }
  0xe9   : > { %836 = vst.msk [vmem:[#allocation2 + $0xe1] sm:$0xff] %vm390_vm1, %v803_v26  ;;  %v808_v34 = vmax.f32 %v776_v28, 0.0  ;;  %v738_v36 = vmul.f32 %v3365_v32, %v4485_v51  ;;  %v774_v38 = vadd.f32 %v4490_v53, %v735_v30  ;;  %v600_v39 = vpop.f32.mrf.mxu0 }
  0xea   : > { %v664_v40 = vpop.f32.mrf.mxu1  ;;  %825 = vst.msk [vmem:[#allocation2 + $0x61] sm:$0xff] %vm390_vm1, %v792_v33  ;;  %v761_v41 = vadd.f32 %v4490_v53, %v722_v35  ;;  %v720_v43 = vmul.f32 %v4485_v51, %v600_v39  ;;  %v790_v45 = vmax.f32 %v758_v37, 0.0 }
  0xeb   : > { %841 = vst.msk [vmem:[#allocation2 + $0x121] sm:$0xff] %vm390_vm1, %v808_v34  ;;  %v777_v42 = vadd.f32 %v4490_v53, %v738_v36  ;;  %v736_v44 = vmul.f32 %v4485_v51, %v664_v40  ;;  %v806_v46 = vmax.f32 %v774_v38, 0.0  ;;  %v3352_v47 = vpop.f32.mrf.mxu0 }
  0xec   : > { %v3368_v48 = vpop.f32.mrf.mxu1  ;;  %v793_v49 = vmax.f32 %v761_v41, 0.0  ;;  %v759_v52 = vadd.f32 %v4490_v53, %v720_v43  ;;  %823 = vst.msk [vmem:[#allocation2 + $0x49] sm:$0xff] %vm390_vm1, %v790_v45  ;;  %v725_v55 = vmul.f32 %v3352_v47, %v4485_v51 }
  0xed   : > { %v809_v50 = vmax.f32 %v777_v42, 0.0  ;;  %v775_v54 = vadd.f32 %v4490_v53, %v736_v44  ;;  %839 = vst.msk [vmem:[#allocation2 + $0x109] sm:$0xff] %vm390_vm1, %v806_v46  ;;  %v741_v56 = vmul.f32 %v3368_v48, %v4485_v51  ;;  %v613_v57 = vpop.f32.mrf.mxu0 }
  0xee   : > { %v677_v58 = vpop.f32.mrf.mxu1  ;;  %826 = vst.msk [vmem:[#allocation2 + $0x69] sm:$0xff] %vm390_vm1, %v793_v49  ;;  %v791_v59 = vmax.f32 %v759_v52, 0.0  ;;  %v723_v61 = vmul.f32 %v4485_v51, %v613_v57  ;;  %v764_v63 = vadd.f32 %v4490_v53, %v725_v55 }
  0xef   : > { %842 = vst.msk [vmem:[#allocation2 + $0x129] sm:$0xff] %vm390_vm1, %v809_v50  ;;  %v807_v60 = vmax.f32 %v775_v54, 0.0  ;;  %v739_v62 = vmul.f32 %v4485_v51, %v677_v58  ;;  %v780_v0 = vadd.f32 %v4490_v53, %v741_v56  ;;  %v3353_v1 = vpop.f32.mrf.mxu0 }
  0xf0   : > { %v3369_v2 = vpop.f32.mrf.mxu1  ;;  %824 = vst.msk [vmem:[#allocation2 + $0x51] sm:$0xff] %vm390_vm1, %v791_v59  ;;  %v762_v3 = vadd.f32 %v4490_v53, %v723_v61  ;;  %v726_v5 = vmul.f32 %v3353_v1, %v4485_v51  ;;  %v796_v7 = vmax.f32 %v764_v63, 0.0 }
  0xf1   : > { %840 = vst.msk [vmem:[#allocation2 + $0x111] sm:$0xff] %vm390_vm1, %v807_v60  ;;  %v778_v4 = vadd.f32 %v4490_v53, %v739_v62  ;;  %v742_v6 = vmul.f32 %v3369_v2, %v4485_v51  ;;  %v812_v8 = vmax.f32 %v780_v0, 0.0  ;;  %v616_v9 = vpop.f32.mrf.mxu0 }
  0xf2   : > { %v680_v10 = vpop.f32.mrf.mxu1  ;;  %v794_v11 = vmax.f32 %v762_v3, 0.0  ;;  %v765_v13 = vadd.f32 %v4490_v53, %v726_v5  ;;  %829 = vst.msk [vmem:[#allocation2 + $0x91] sm:$0xff] %vm390_vm1, %v796_v7  ;;  %v724_v15 = vmul.f32 %v4485_v51, %v616_v9 }
  0xf3   : > { %v810_v12 = vmax.f32 %v778_v4, 0.0  ;;  %v781_v14 = vadd.f32 %v4490_v53, %v742_v6  ;;  %845 = vst.msk [vmem:[#allocation2 + $0x151] sm:$0xff] %vm390_vm1, %v812_v8  ;;  %v740_v16 = vmul.f32 %v4485_v51, %v680_v10  ;;  %v3356_v17 = vpop.f32.mrf.mxu0 }
  0xf4   : > { %v3372_v18 = vpop.f32.mrf.mxu1  ;;  %827 = vst.msk [vmem:[#allocation2 + $0x79] sm:$0xff] %vm390_vm1, %v794_v11  ;;  %v797_v19 = vmax.f32 %v765_v13, 0.0  ;;  %v729_v21 = vmul.f32 %v3356_v17, %v4485_v51  ;;  %v763_v23 = vadd.f32 %v4490_v53, %v724_v15 }
  0xf5   : > { %843 = vst.msk [vmem:[#allocation2 + $0x139] sm:$0xff] %vm390_vm1, %v810_v12  ;;  %v813_v20 = vmax.f32 %v781_v14, 0.0  ;;  %v745_v22 = vmul.f32 %v3372_v18, %v4485_v51  ;;  %v779_v24 = vadd.f32 %v4490_v53, %v740_v16  ;;  %v629_v25 = vpop.f32.mrf.mxu0 }
  0xf6   : > { %v693_v26 = vpop.f32.mrf.mxu1  ;;  %830 = vst.msk [vmem:[#allocation2 + $0x99] sm:$0xff] %vm390_vm1, %v797_v19  ;;  %v768_v27 = vadd.f32 %v4490_v53, %v729_v21  ;;  %v727_v29 = vmul.f32 %v4485_v51, %v629_v25  ;;  %v795_v31 = vmax.f32 %v763_v23, 0.0 }
  0xf7   : > { %846 = vst.msk [vmem:[#allocation2 + $0x159] sm:$0xff] %vm390_vm1, %v813_v20  ;;  %v784_v28 = vadd.f32 %v4490_v53, %v745_v22  ;;  %v743_v30 = vmul.f32 %v4485_v51, %v693_v26  ;;  %v811_v32 = vmax.f32 %v779_v24, 0.0  ;;  %v3357_v33 = vpop.f32.mrf.mxu0 }
  0xf8   : > { %v3373_v34 = vpop.f32.mrf.mxu1  ;;  %v800_v35 = vmax.f32 %v768_v27, 0.0  ;;  %v766_v37 = vadd.f32 %v4490_v53, %v727_v29  ;;  %828 = vst.msk [vmem:[#allocation2 + $0x81] sm:$0xff] %vm390_vm1, %v795_v31  ;;  %v730_v39 = vmul.f32 %v3357_v33, %v4485_v51 }
  0xf9   : > { %v816_v36 = vmax.f32 %v784_v28, 0.0  ;;  %v782_v38 = vadd.f32 %v4490_v53, %v743_v30  ;;  %844 = vst.msk [vmem:[#allocation2 + $0x141] sm:$0xff] %vm390_vm1, %v811_v32  ;;  %v746_v40 = vmul.f32 %v3373_v34, %v4485_v51  ;;  %v632_v41 = vpop.f32.mrf.mxu0 }
  0xfa   : > { %v696_v42 = vpop.f32.mrf.mxu1  ;;  %833 = vst.msk [vmem:[#allocation2 + $0xc1] sm:$0xff] %vm390_vm1, %v800_v35  ;;  %v798_v43 = vmax.f32 %v766_v37, 0.0  ;;  %v728_v45 = vmul.f32 %v4485_v51, %v632_v41  ;;  %v769_v47 = vadd.f32 %v4490_v53, %v730_v39 }
  0xfb   : > { %849 = vst.msk [vmem:[#allocation2 + $0x181] sm:$0xff] %vm390_vm1, %v816_v36  ;;  %v814_v44 = vmax.f32 %v782_v38, 0.0  ;;  %v744_v46 = vmul.f32 %v4485_v51, %v696_v42  ;;  %v785_v48 = vadd.f32 %v4490_v53, %v746_v40 }
  0xfc   : > { %831 = vst.msk [vmem:[#allocation2 + $0xa9] sm:$0xff] %vm390_vm1, %v798_v43  ;;  %v767_v49 = vadd.f32 %v4490_v53, %v728_v45  ;;  %v801_v52 = vmax.f32 %v769_v47, 0.0 }
  0xfd   : > { %847 = vst.msk [vmem:[#allocation2 + $0x169] sm:$0xff] %vm390_vm1, %v814_v44  ;;  %v783_v50 = vadd.f32 %v4490_v53, %v744_v46  ;;  %v817_v54 = vmax.f32 %v785_v48, 0.0 }
  0xfe   : > { %v799_v55 = vmax.f32 %v767_v49, 0.0  ;;  %834 = vst.msk [vmem:[#allocation2 + $0xc9] sm:$0xff] %vm390_vm1, %v801_v52 }
  0xff   : > { %v815_v56 = vmax.f32 %v783_v50, 0.0  ;;  %850 = vst.msk [vmem:[#allocation2 + $0x189] sm:$0xff] %vm390_vm1, %v817_v54 }
 0x100   : > { %832 = vst.msk [vmem:[#allocation2 + $0xb1] sm:$0xff] %vm390_vm1, %v799_v55 }
 0x101   : > { %848 = vst.msk [vmem:[#allocation2 + $0x171] sm:$0xff] %vm390_vm1, %v815_v56 }
 0x102 PF: > { %s3125_s22 = smul.u32 192, %s4196_s13  ;;  %s4215_s24 = smov 4   ;;  %v4152_v20 = vld [vmem:[%s5826_s4 + $0x10] ss:$0 sps:$4 sm:$0x33]   ;;  %vm1705_vm3 = vcmask 1041408  }
 0x103   : > { %s4216_s26 = smov 8   ;;  %s4217_s27 = smov 124   ;;  %3458 = vmatprep.subr.msk.bf16.mxu0 %vm1705_vm3, %v4152_v20  ;;  %v1707_v22 = vsel %vm1705_vm3, %v4152_v20, 0  ;;  %v4153_v23 = vld [vmem:[%s5826_s4 + $0x8] sm:$0xff]   ;;  %v4155_v28 = vld [vmem:[%s5826_s4] sm:$0xff]   ;;  %v4157_v31 = vld [vmem:[%s5826_s4 + $0x14] sm:$0xff]  }
 0x104   : > { %s4589_s23 = scalar_lea.vmem [#allocation2], %s3125_s22  ;;  %s5835_s28 = smov 12   ;;  %3375 = vmatpush3.bf16.msra.mxu0 %v1707_v22  ;;  %v4154_v24 = vld [vmem:[%s5826_s4 + $0x24] ss:$0 sps:$4 sm:$0x33]   ;;  %v4156_v29 = vld [vmem:[%s5826_s4 + $0x1c] sm:$0xff]  }
 0x105   : > { %s5833_s29 = smov 16   ;;  %s4220_s30 = smov 20   ;;  %3376 = vmatprep.subr.bf16.mxu0 %v4153_v23  ;;  %v2459_v25 = vsel %vm1705_vm3, %v4154_v24, 0  ;;  %3459 = vmatprep.subr.msk.bf16.mxu1 %vm1705_vm3, %v4154_v24  ;;  %vm1516_vm4 = vcmask 31744   ;;  %vm1533_vm5 = vcmask 64512   ;;  %vm1550_vm6 = vcmask 97280  }
 0x106   : > { %s4221_s12 = smov 24   ;;  %s4222_s19 = smov 28   ;;  %3397 = vmatpush3.bf16.msra.mxu1 %v2459_v25  ;;  %vm1567_vm7 = vcmask 130048   ;;  %vm1584_vm8 = vcmask 162816   ;;  %vm1601_vm9 = vcmask 195584   ;;  %vm1618_vm10 = vcmask 228352  }
 0x107   : > { %3398 = vmatprep.subr.bf16.mxu1 %v4156_v29  ;;  %s4223_s20 = smov 32   ;;  %vm1635_vm11 = vcmask 261120   ;;  %vm1680_vm12 = vcmask 293888  }
 0x108   : > { %v4592_v51 = vld [vmem:[%s4589_s23 + $0x19] sm:$0xff]  ;;  %v4595_v53 = vld [vmem:[%s4589_s23 + $0x21] sm:$0xff]  ;;  %v4603_v59 = vld [vmem:[%s4589_s23 + $0x9] sm:$0xff]  ;;  %3377 = vmatpush3.bf16.msra.mxu0 %v4153_v23 }
 0x109   : > { %v4598_v57 = vld [vmem:[%s4589_s23 + $0x1] sm:$0xff]  ;;  %v3522_v58 = vpack.i.bf16 %v4595_v53, %v4592_v51  ;;  %v887_v61 = vld [vmem:[%s4589_s23 + $0xa] sm:$0xff]  ;;  %v4620_v3 = vld [vmem:[%s4589_s23 + $0x18] sm:$0xff]  ;;  %3378 = vmatprep.subr.bf16.mxu0 %v4155_v28 }
 0x10a   : > { %v886_v60 = vld [vmem:[%s4589_s23 + $0x2] sm:$0xff]  ;;  %v3512_v62 = vpack.i.bf16 %v4603_v59, %v4598_v57  ;;  %v888_v6 = vld [vmem:[%s4589_s23 + $0x1a] sm:$0xff]  ;;  %v4636_v9 = vld [vmem:[%s4589_s23 + $0x30] sm:$0xff]  ;;  %3399 = vmatpush3.bf16.msra.mxu1 %v4156_v29 }
 0x10b   : > { %v4610_v63 = vld [vmem:[%s4589_s23] sm:$0xff]  ;;  %v4613_v0 = vld [vmem:[%s4589_s23 + $0x8] sm:$0xff]  ;;  %3523 = vrot.lane.b32.xlu1 %v3522_v58, %s4215_s24  ;;  %v3527_v1 = vpack.i.bf16 %v887_v61, %v886_v60  ;;  %v4639_v10 = vld [vmem:[%s4589_s23 + $0x38] sm:$0xff]  ;;  %3400 = vmatprep.subr.bf16.mxu1 %v4157_v31 }
 0x10c   : > { %3513 = vrot.lane.b32.xlu0 %v3512_v62, %s4215_s24  ;;  %v3517_v2 = vpack.i.bf16 %v4613_v0, %v4610_v63  ;;  %v4623_v4 = vld [vmem:[%s4589_s23 + $0x20] sm:$0xff]  ;;  %v4645_v11 = vpack.i.bf16 %v4639_v10, %v4636_v9  ;;  %v4651_v12 = vld [vmem:[%s4589_s23 + $0x31] sm:$0xff]  ;;  %v4671_v18 = vld [vmem:[%s4589_s23 + $0x48] sm:$0xff]  ;;  %3379 = vmatpush3.bf16.msra.mxu0 %v4155_v28 }
 0x10d   : > { %v3532_v5 = vpack.i.bf16 %v4623_v4, %v4620_v3  ;;  %v889_v7 = vld [vmem:[%s4589_s23 + $0x22] sm:$0xff]  ;;  %v4654_v13 = vld [vmem:[%s4589_s23 + $0x39] sm:$0xff]  ;;  %v4674_v19 = vld [vmem:[%s4589_s23 + $0x50] sm:$0xff] }
 0x10e   : > { %v3542_v8 = vpack.i.bf16 %v889_v7, %v888_v6  ;;  %v3582_v14 = vpack.i.bf16 %v4654_v13, %v4651_v12  ;;  %v3162_v15 = vld [vmem:[%s4589_s23 + $0x32] sm:$0xff]  ;;  %v3163_v16 = vld [vmem:[%s4589_s23 + $0x3a] sm:$0xff]  ;;  %v3622_v21 = vpack.i.bf16 %v4674_v19, %v4671_v18  ;;  %v4696_v26 = vld [vmem:[%s4589_s23 + $0x49] sm:$0xff]  ;;  %3401 = vmatpush3.bf16.msra.mxu1 %v4157_v31 }
 0x10f   : > { %3528 = vrot.lane.b32.xlu1 %v3527_v1, %s4216_s26  ;;  %v3602_v17 = vpack.i.bf16 %v3163_v16, %v3162_v15  ;;  %v4699_v27 = vld [vmem:[%s4589_s23 + $0x51] sm:$0xff]  ;;  %v3134_v35 = vld [vmem:[%s4589_s23 + $0x60] sm:$0xff]  ;;  %v3135_v36 = vld [vmem:[%s4589_s23 + $0x68] sm:$0xff] }
 0x110   : > { %3518 = vrot.lane.b32.xlu0 %v3517_v2, %s4217_s27  ;;  %v3642_v30 = vpack.i.bf16 %v4699_v27, %v4696_v26  ;;  %v3212_v32 = vld [vmem:[%s4589_s23 + $0x4a] sm:$0xff]  ;;  %v3213_v33 = vld [vmem:[%s4589_s23 + $0x52] sm:$0xff]  ;;  %v3722_v37 = vpack.i.bf16 %v3135_v36, %v3134_v35  ;;  %v3150_v38 = vld [vmem:[%s4589_s23 + $0x61] sm:$0xff] }
 0x111   : > { %v3667_v34 = vpack.i.bf16 %v3213_v33, %v3212_v32  ;;  %v3151_v39 = vld [vmem:[%s4589_s23 + $0x69] sm:$0xff]  ;;  %v3184_v44 = vld [vmem:[%s4589_s23 + $0x78] sm:$0xff]  ;;  %v3185_v45 = vld [vmem:[%s4589_s23 + $0x80] sm:$0xff] }
 0x112   : > { %v3742_v40 = vpack.i.bf16 %v3151_v39, %v3150_v38  ;;  %v3166_v41 = vld [vmem:[%s4589_s23 + $0x62] sm:$0xff]  ;;  %v3167_v42 = vld [vmem:[%s4589_s23 + $0x6a] sm:$0xff]  ;;  %v3782_v46 = vpack.i.bf16 %v3185_v45, %v3184_v44  ;;  %v3200_v47 = vld [vmem:[%s4589_s23 + $0x79] sm:$0xff] }
 0x113   : > { %3538 = vrot.lane.b32.xlu1 %v3527_v1, %s4215_s24  ;;  %v3762_v43 = vpack.i.bf16 %v3167_v42, %v3166_v41  ;;  %v3201_v48 = vld [vmem:[%s4589_s23 + $0x81] sm:$0xff]  ;;  %v3138_v16 = vld [vmem:[%s4589_s23 + $0x90] sm:$0xff]  ;;  %v3155_v22 = vld [vmem:[%s4589_s23 + $0x99] sm:$0xff] }
 0x114   : > { %3533 = vrot.lane.b32.xlu0 %v3532_v5, %s4217_s27  ;;  %v4760_v49 = vpack.i.bf16 %v3201_v48, %v3200_v47  ;;  %v3216_v54 = vld [vmem:[%s4589_s23 + $0x7a] sm:$0xff]  ;;  %v3217_v55 = vld [vmem:[%s4589_s23 + $0x82] sm:$0xff]  ;;  %v3170_v23 = vld [vmem:[%s4589_s23 + $0x92] sm:$0xff] }
 0x115   : > { %v4776_v60 = vpack.i.bf16 %v3217_v55, %v3216_v54  ;;  %v3171_v25 = vld [vmem:[%s4589_s23 + $0x9a] sm:$0xff]  ;;  %v3188_v28 = vld [vmem:[%s4589_s23 + $0xa8] sm:$0xff]  ;;  %v3189_v29 = vld [vmem:[%s4589_s23 + $0xb0] sm:$0xff] }
 0x116   : > { %v3205_v35 = vld [vmem:[%s4589_s23 + $0xb1] sm:$0xff]  ;;  %v4848_v41 = vpack.i.bf16 %v3189_v29, %v3188_v28 }
 0x117   : > { %3548 = vrot.lane.b32.xlu1 %v3532_v5, %s5835_s28 }
 0x118   : > { %3543 = vrot.lane.b32.xlu0 %v3542_v8, %s4216_s26 }
 0x11b   : > { %3558 = vrot.lane.b32.xlu1 %v3532_v5, %s4216_s26 }
 0x11c   : > { %3553 = vrot.lane.b32.xlu0 %v3542_v8, %s4215_s24 }
 0x11f   : > { %3568 = vrot.lane.b32.xlu1 %v3522_v58, %s5833_s29 }
 0x120   : > { %3563 = vrot.lane.b32.xlu0 %v4645_v11, %s5835_s28 }
 0x123   : > { %3578 = vrot.lane.b32.xlu1 %v3522_v58, %s5835_s28 }
 0x124   : > { %3573 = vrot.lane.b32.xlu0 %v4645_v11, %s4216_s26 }
 0x127   : > { %3588 = vrot.lane.b32.xlu1 %v3542_v8, %s4220_s30 }
 0x128   : > { %3583 = vrot.lane.b32.xlu0 %v3582_v14, %s5833_s29 }
 0x12b   : > { %3598 = vrot.lane.b32.xlu1 %v3542_v8, %s5833_s29 }
 0x12c   : > { %3593 = vrot.lane.b32.xlu0 %v3582_v14, %s5835_s28  ;;  %s5838_s28 = smov 12  }
 0x12f   : > { %3608 = vrot.lane.b32.xlu1 %v4645_v11, %s4221_s12 }
 0x130   : > { %3603 = vrot.lane.b32.xlu0 %v3602_v17, %s4220_s30 }
 0x133   : > { %3618 = vrot.lane.b32.xlu1 %v4645_v11, %s4220_s30 }
 0x134   : > { %3613 = vrot.lane.b32.xlu0 %v3602_v17, %s5833_s29  ;;  %s5839_s29 = smov 16  }
 0x137   : > { %3628 = vrot.lane.b32.xlu1 %v3582_v14, %s4222_s19 }
 0x138   : > { %3623 = vrot.lane.b32.xlu0 %v3622_v21, %s4221_s12 }
 0x13b   : > { %3638 = vrot.lane.b32.xlu1 %v3582_v14, %s4221_s12 }
 0x13c   : > { %3633 = vrot.lane.b32.xlu0 %v3622_v21, %s4220_s30 }
 0x13f   : > { %3648 = vrot.lane.b32.xlu1 %v3602_v17, %s4223_s20 }
 0x140   : > { %3643 = vrot.lane.b32.xlu0 %v3642_v30, %s4222_s19 }
 0x143   : > { %3658 = vrot.lane.b32.xlu1 %v3602_v17, %s4222_s19 }
 0x144   : > { %3653 = vrot.lane.b32.xlu0 %v3642_v30, %s4221_s12 }
 0x147   : > { %3668 = vrot.lane.b32.xlu1 %v3667_v34, %s4223_s20 }
 0x148   : > { %3663 = vrot.lane.b32.xlu0 %v3582_v14, %s4215_s24 }
 0x14b   : > { %3678 = vrot.lane.b32.xlu1 %v3667_v34, %s4222_s19 }
 0x14c   : > { %3673 = vrot.lane.b32.xlu0 %v4645_v11, %s4217_s27 }
 0x14f   : > { %3688 = vrot.lane.b32.xlu1 %v3602_v17, %s4216_s26 }
 0x150   : > { %3683 = vrot.lane.b32.xlu0 %v3642_v30, %s4215_s24 }
 0x153   : > { %3698 = vrot.lane.b32.xlu1 %v3602_v17, %s4215_s24  ;;  %v3139_v17 = vld [vmem:[%s4589_s23 + $0x98] sm:$0xff] }
 0x154   : > { %3693 = vrot.lane.b32.xlu0 %v3622_v21, %s4217_s27  ;;  %v4826_v24 = vpack.i.bf16 %v3139_v17, %v3138_v16 }
 0x157   : > { %3708 = vrot.lane.b32.xlu1 %v3622_v21, %s5838_s28 }
 0x158   : > { %3703 = vrot.lane.b32.xlu0 %v3667_v34, %s4216_s26 }
 0x15b   : > { %3718 = vrot.lane.b32.xlu1 %v3622_v21, %s4216_s26  ;;  %v3154_v21 = vld [vmem:[%s4589_s23 + $0x91] sm:$0xff] }
 0x15c   : > { %3713 = vrot.lane.b32.xlu0 %v3667_v34, %s4215_s24 }
 0x15f   : > { %3728 = vrot.lane.b32.xlu1 %v3642_v30, %s5839_s29 }
 0x160   : > { %3723 = vrot.lane.b32.xlu0 %v3722_v37, %s5838_s28 }
 0x163   : > { %3738 = vrot.lane.b32.xlu1 %v3642_v30, %s5838_s28 }
 0x164   : > { %3733 = vrot.lane.b32.xlu0 %v3722_v37, %s4216_s26 }
 0x167   : > { %3748 = vrot.lane.b32.xlu1 %v3667_v34, %s4220_s30 }
 0x168   : > { %3743 = vrot.lane.b32.xlu0 %v3742_v40, %s5839_s29 }
 0x16b   : > { %3758 = vrot.lane.b32.xlu1 %v3667_v34, %s5839_s29  ;;  %v3204_v34 = vld [vmem:[%s4589_s23 + $0xa9] sm:$0xff] }
 0x16c   : > { %3753 = vrot.lane.b32.xlu0 %v3742_v40, %s5838_s28  ;;  %v4855_v45 = vpack.i.bf16 %v3205_v35, %v3204_v34 }
 0x16f   : > { %3768 = vrot.lane.b32.xlu1 %v3722_v37, %s4221_s12 }
 0x170   : > { %3763 = vrot.lane.b32.xlu0 %v3762_v43, %s4220_s30 }
 0x173   : > { %3778 = vrot.lane.b32.xlu1 %v3722_v37, %s4220_s30 }
 0x174   : > { %3773 = vrot.lane.b32.xlu0 %v3762_v43, %s5839_s29 }
 0x177   : > { %3788 = vrot.lane.b32.xlu1 %v3742_v40, %s4222_s19 }
 0x178   : > { %3783 = vrot.lane.b32.xlu0 %v3782_v46, %s4221_s12 }
 0x17b   : > { %3798 = vrot.lane.b32.xlu1 %v3742_v40, %s4221_s12 }
 0x17c   : > { %3793 = vrot.lane.b32.xlu0 %v3782_v46, %s4220_s30 }
 0x17d   : > { %v4762_v50 = vpop.permute.xlu1 %3523 }
 0x17e   : > { %v4764_v52 = vpop.permute.xlu0 %3513  ;;  %v3526_v30 = vunpack.i.h.bf16 %v4762_v50  ;;  %v3525_v31 = vunpack.i.l.bf16 %v4762_v50 }
 0x17f   : > { %3808 = vrot.lane.b32.xlu1 %v3762_v43, %s4223_s20  ;;  %v3515_v32 = vunpack.i.l.bf16 %v4764_v52  ;;  %v3516_v38 = vunpack.i.h.bf16 %v4764_v52 }
 0x180   : > { %3803 = vrot.lane.b32.xlu0 %v4760_v49, %s4222_s19  ;;  %v1520_v47 = vsel %vm1516_vm4, %v4623_v4, %v3526_v30 }
 0x181   : > { %v4771_v56 = vpop.permute.xlu1 %3528  ;;  %v1517_v48 = vsel %vm1516_vm4, %v4610_v63, %v3515_v32 }
 0x182   : > { %v4773_v58 = vpop.permute.xlu0 %3518  ;;  %v3530_v39 = vunpack.i.l.bf16 %v4771_v56  ;;  %v3531_v42 = vunpack.i.h.bf16 %v4771_v56 }
 0x183   : > { %3818 = vrot.lane.b32.xlu1 %v3762_v43, %s4222_s19  ;;  %v3520_v44 = vunpack.i.l.bf16 %v4773_v58 }
 0x184   : > { %3813 = vrot.lane.b32.xlu0 %v4760_v49, %s4221_s12  ;;  %v1534_v4 = vsel %vm1533_vm5, %v1517_v48, %v3530_v39 }
 0x185   : > { %v4780_v61 = vpop.permute.xlu1 %3538 }
 0x186   : > { %v4782_v62 = vpop.permute.xlu0 %3533  ;;  %v3540_v50 = vunpack.i.l.bf16 %v4780_v61  ;;  %v3541_v54 = vunpack.i.h.bf16 %v4780_v61 }
 0x187   : > { %3828 = vrot.lane.b32.xlu1 %v4776_v60, %s4223_s20  ;;  %v3536_v55 = vunpack.i.h.bf16 %v4782_v62  ;;  %v3535_v56 = vunpack.i.l.bf16 %v4782_v62 }
 0x188   : > { %3823 = vrot.lane.b32.xlu0 %v3742_v40, %s4215_s24  ;;  %v4846_v40 = vpack.i.bf16 %v3171_v25, %v3170_v23 }
 0x189   : > { %v4787_v1 = vpop.permute.xlu1 %3548 }
 0x18a   : > { %v4789_v2 = vpop.permute.xlu0 %3543  ;;  %v3551_v63 = vunpack.i.h.bf16 %v4787_v1 }
 0x18b   : > { %3838 = vrot.lane.b32.xlu1 %v4776_v60, %s4222_s19  ;;  %v3546_v17 = vunpack.i.h.bf16 %v4789_v2 }
 0x18c   : > { %3833 = vrot.lane.b32.xlu0 %v3722_v37, %s4217_s27  ;;  %v4840_v37 = vpack.i.bf16 %v3155_v22, %v3154_v21  ;;  %v2277_v21 = vsel %vm1516_vm4, %v3520_v44, %v4598_v57  ;;  %v2280_v57 = vsel %vm1516_vm4, %v3536_v55, %v4595_v53 }
 0x18d   : > { %v4794_v5 = vpop.permute.xlu1 %3558 }
 0x18e   : > { %v4796_v6 = vpop.permute.xlu0 %3553  ;;  %v3561_v22 = vunpack.i.h.bf16 %v4794_v5  ;;  %v3560_v23 = vunpack.i.l.bf16 %v4794_v5  ;;  %v1537_v5 = vsel %vm1533_vm5, %v1520_v47, %v3546_v17 }
 0x18f   : > { %3848 = vrot.lane.b32.xlu1 %v3762_v43, %s4216_s26 }
 0x190   : > { %3843 = vrot.lane.b32.xlu0 %v4760_v49, %s4215_s24 }
 0x191   : > { %v4801_v7 = vpop.permute.xlu1 %3568 }
 0x192   : > { %v4803_v8 = vpop.permute.xlu0 %3563  ;;  %v3570_v32 = vunpack.i.l.bf16 %v4801_v7 }
 0x193   : > { %3858 = vrot.lane.b32.xlu1 %v3762_v43, %s4215_s24  ;;  %v3521_v43 = vunpack.i.h.bf16 %v4773_v58  ;;  %v3550_v58 = vunpack.i.l.bf16 %v4787_v1  ;;  %v2293_v1 = vsel %vm1533_vm5, %v2277_v21, %v3540_v50  ;;  %v3566_v34 = vunpack.i.h.bf16 %v4803_v8 }
 0x194   : > { %3853 = vrot.lane.b32.xlu0 %v3782_v46, %s4217_s27  ;;  %v3565_v35 = vunpack.i.l.bf16 %v4803_v8 }
 0x195   : > { %v4807_v11 = vpop.permute.xlu1 %3578  ;;  %v2278_v62 = vsel %vm1516_vm4, %v3521_v43, %v4603_v59  ;;  %v1551_v28 = vsel %vm1550_vm6, %v1534_v4, %v3550_v58 }
 0x196   : > { %v4809_v14 = vpop.permute.xlu0 %3573  ;;  %v2294_v59 = vsel %vm1533_vm5, %v2278_v62, %v3541_v54  ;;  %v1568_v50 = vsel %vm1567_vm7, %v1551_v28, %v3570_v32 }
 0x197   : > { %3868 = vrot.lane.b32.xlu1 %v3782_v46, %s5838_s28  ;;  %v3576_v44 = vunpack.i.h.bf16 %v4809_v14  ;;  %v3575_v8 = vunpack.i.l.bf16 %v4809_v14  ;;  %v1554_v14 = vsel %vm1550_vm6, %v1537_v5, %v3566_v34 }
 0x198   : > { %3863 = vrot.lane.b32.xlu0 %v4776_v60, %s4216_s26 }
 0x199   : > { %v4814_v15 = vpop.permute.xlu1 %3588 }
 0x19a   : > { %v4818_v20 = vpop.permute.xlu0 %3583  ;;  %v3591_v54 = vunpack.i.h.bf16 %v4814_v15 }
 0x19b   : > { %3878 = vrot.lane.b32.xlu1 %v3782_v46, %s4216_s26  ;;  %v1519_v46 = vsel %vm1516_vm4, %v4620_v3, %v3525_v31  ;;  %v1518_v3 = vsel %vm1516_vm4, %v4613_v0, %v3516_v38  ;;  %v3545_v0 = vunpack.i.l.bf16 %v4789_v2  ;;  %v2279_v2 = vsel %vm1516_vm4, %v3535_v56, %v4592_v51 }
 0x19c   : > { %3873 = vrot.lane.b32.xlu0 %v4776_v60, %s4215_s24  ;;  %v1535_v61 = vsel %vm1533_vm5, %v1518_v3, %v3531_v42  ;;  %v3556_v31 = vunpack.i.h.bf16 %v4796_v6  ;;  %v3571_v51 = vunpack.i.h.bf16 %v4801_v7  ;;  %v2309_v38 = vsel %vm1550_vm6, %v2293_v1, %v3560_v23 }
 0x19d   : > { %v4834_v33 = vpop.permute.xlu1 %3598  ;;  %v1552_v30 = vsel %vm1550_vm6, %v1535_v61, %v3551_v63  ;;  %v1536_v53 = vsel %vm1533_vm5, %v1519_v46, %v3545_v0  ;;  %v3580_v42 = vunpack.i.l.bf16 %v4807_v11  ;;  %v3581_v7 = vunpack.i.h.bf16 %v4807_v11 }
 0x19e   : > { %v4838_v36 = vpop.permute.xlu0 %3593  ;;  %v3590_v46 = vunpack.i.l.bf16 %v4814_v15  ;;  %v2296_v48 = vsel %vm1533_vm5, %v2280_v57, %v3556_v31  ;;  %v3585_v55 = vunpack.i.l.bf16 %v4818_v20  ;;  %v1569_v11 = vsel %vm1567_vm7, %v1552_v30, %v3571_v51 }
 0x19f   : > { %3888 = vrot.lane.b32.xlu1 %v4760_v49, %s5839_s29  ;;  %v1553_v56 = vsel %vm1550_vm6, %v1536_v53, %v3565_v35  ;;  %v3586_v58 = vunpack.i.h.bf16 %v4818_v20  ;;  %v2325_v3 = vsel %vm1567_vm7, %v2309_v38, %v3580_v42  ;;  %v3600_v15 = vunpack.i.l.bf16 %v4834_v33 }
 0x1a0   : > { %3883 = vrot.lane.b32.xlu0 %v4826_v24, %s5838_s28  ;;  %v4944_v20 = vsel %vm1550_vm6, %v2296_v48, %v3576_v44  ;;  %v1585_v62 = vsel %vm1584_vm8, %v1568_v50, %v3590_v46  ;;  %v1586_v0 = vsel %vm1584_vm8, %v1569_v11, %v3591_v54  ;;  %v1570_v1 = vsel %vm1567_vm7, %v1553_v56, %v3585_v55 }
 0x1a1   : > { %v4864_v52 = vpop.permute.xlu1 %3608  ;;  %v3595_v57 = vunpack.i.l.bf16 %v4838_v36 }
 0x1a2   : > { %v4870_v16 = vpop.permute.xlu0 %3603  ;;  %v3611_v4 = vunpack.i.h.bf16 %v4864_v52 }
 0x1a3   : > { %3898 = vrot.lane.b32.xlu1 %v4760_v49, %s5838_s28  ;;  %v3555_v49 = vunpack.i.l.bf16 %v4796_v6  ;;  %v2310_v6 = vsel %vm1550_vm6, %v2294_v59, %v3561_v22  ;;  %v3596_v59 = vunpack.i.h.bf16 %v4838_v36  ;;  %v3605_v28 = vunpack.i.l.bf16 %v4870_v16 }
 0x1a4   : > { %3893 = vrot.lane.b32.xlu0 %v4826_v24, %s4216_s26  ;;  %v2326_v17 = vsel %vm1567_vm7, %v2310_v6, %v3581_v7  ;;  %v1603_v31 = vsel %vm1601_vm9, %v1586_v0, %v3611_v4  ;;  %v3606_v42 = vunpack.i.h.bf16 %v4870_v16 }
 0x1a5   : > { %v4891_v25 = vpop.permute.xlu1 %3618  ;;  %v2295_v39 = vsel %vm1533_vm5, %v2279_v2, %v3555_v49  ;;  %v3601_v49 = vunpack.i.h.bf16 %v4834_v33  ;;  %v2341_v2 = vsel %vm1584_vm8, %v2325_v3, %v3600_v15  ;;  %v1587_v7 = vsel %vm1584_vm8, %v1570_v1, %v3605_v28 }
 0x1a6   : > { %v4899_v29 = vpop.permute.xlu0 %3613  ;;  %v4941_v61 = vsel %vm1550_vm6, %v2295_v39, %v3575_v8  ;;  %v3621_v32 = vunpack.i.h.bf16 %v4891_v25  ;;  %v3620_v33 = vunpack.i.l.bf16 %v4891_v25 }
 0x1a7   : > { %3908 = vrot.lane.b32.xlu1 %v4776_v60, %s4220_s30  ;;  %v2342_v39 = vsel %vm1584_vm8, %v2326_v17, %v3601_v49  ;;  %v3616_v15 = vunpack.i.h.bf16 %v4899_v29 }
 0x1a8   : > { %3903 = vrot.lane.b32.xlu0 %v4840_v37, %s5839_s29  ;;  %v2357_v16 = vsel %vm1601_vm9, %v2341_v2, %v3620_v33  ;;  %v2358_v11 = vsel %vm1601_vm9, %v2342_v39, %v3621_v32 }
 0x1a9   : > { %v3629_v43 = vpop.permute.xlu1 %3628 }
 0x1aa   : > { %v4921_v47 = vpop.permute.xlu0 %3623  ;;  %v3631_v22 = vunpack.i.h.bf16 %v3629_v43  ;;  %v3630_v23 = vunpack.i.l.bf16 %v3629_v43 }
 0x1ab   : > { %3918 = vrot.lane.b32.xlu1 %v4776_v60, %s5839_s29  ;;  %v3610_v60 = vunpack.i.l.bf16 %v4864_v52  ;;  %v1571_v52 = vsel %vm1567_vm7, %v1554_v14, %v3586_v58  ;;  %v3626_v44 = vunpack.i.h.bf16 %v4921_v47  ;;  %v3625_v8 = vunpack.i.l.bf16 %v4921_v47 }
 0x1ac   : > { %3913 = vrot.lane.b32.xlu0 %v4840_v37, %s5838_s28  ;;  %v1620_v6 = vsel %vm1618_vm10, %v1603_v31, %v3631_v22  ;;  %v1588_v3 = vsel %vm1584_vm8, %v1571_v52, %v3606_v42  ;;  %v2327_v31 = vsel %vm1567_vm7, %v4941_v61, %v3595_v57 }
 0x1ad   : > { %v3639_v63 = vpop.permute.xlu1 %3638  ;;  %v1602_v5 = vsel %vm1601_vm9, %v1585_v62, %v3610_v60  ;;  %v1604_v17 = vsel %vm1601_vm9, %v1587_v7, %v3625_v8  ;;  %v1605_v62 = vsel %vm1601_vm9, %v1588_v3, %v3626_v44 }
 0x1ae   : > { %v4947_v21 = vpop.permute.xlu0 %3633  ;;  %v3641_v36 = vunpack.i.h.bf16 %v3639_v63  ;;  %v3640_v35 = vunpack.i.l.bf16 %v3639_v63  ;;  %v1619_v38 = vsel %vm1618_vm10, %v1602_v5, %v3630_v23  ;;  %v3615_v63 = vunpack.i.l.bf16 %v4899_v29 }
 0x1af   : > { %3928 = vrot.lane.b32.xlu1 %v4826_v24, %s4221_s12  ;;  %v3636_v22 = vunpack.i.h.bf16 %v4947_v21  ;;  %v3635_v23 = vunpack.i.l.bf16 %v4947_v21  ;;  %v2328_v21 = vsel %vm1567_vm7, %v4944_v20, %v3596_v59 }
 0x1b0   : > { %3923 = vrot.lane.b32.xlu0 %v4846_v40, %s4220_s30  ;;  %v2373_v58 = vsel %vm1618_vm10, %v2357_v16, %v3640_v35  ;;  %v2374_v47 = vsel %vm1618_vm10, %v2358_v11, %v3641_v36 }
 0x1b1   : > { %v3649_v30 = vpop.permute.xlu1 %3648 }
 0x1b2   : > { %v3651_v53 = vunpack.i.h.bf16 %v3649_v30  ;;  %v3650_v51 = vunpack.i.l.bf16 %v3649_v30  ;;  %v3644_v34 = vpop.permute.xlu0 %3643 }
 0x1b3   : > { %3938 = vrot.lane.b32.xlu1 %v4826_v24, %s4220_s30  ;;  %v3646_v56 = vunpack.i.h.bf16 %v3644_v34  ;;  %v3645_v14 = vunpack.i.l.bf16 %v3644_v34 }
 0x1b4   : > { %3933 = vrot.lane.b32.xlu0 %v4846_v40, %s5839_s29  ;;  %v1636_v25 = vsel %vm1635_vm11, %v1619_v38, %v3650_v51  ;;  %v1637_v43 = vsel %vm1635_vm11, %v1620_v6, %v3651_v53  ;;  %v2343_v53 = vsel %vm1584_vm8, %v2327_v31, %v3615_v63  ;;  %v2344_v51 = vsel %vm1584_vm8, %v2328_v21, %v3616_v15  ;;  %v3158_v15 = vld [vmem:[%s4589_s23 + $0xc1] sm:$0xff]  ;;  %v3175_v63 = vld [vmem:[%s4589_s23 + $0xca] sm:$0xff] }
 0x1b5   : > { %v3659_v46 = vpop.permute.xlu1 %3658  ;;  %v1652_v48 = vpack.c.bf16 %v1637_v43, %v1636_v25  ;;  %v1621_v28 = vsel %vm1618_vm10, %v1604_v17, %v3645_v14  ;;  %v1622_v30 = vsel %vm1618_vm10, %v1605_v62, %v3646_v56  ;;  %v2359_v61 = vsel %vm1601_vm9, %v2343_v53, %v3635_v23  ;;  %v3220_v25 = vld [vmem:[%s4589_s23 + $0xaa] sm:$0xff]  ;;  %v3221_v43 = vld [vmem:[%s4589_s23 + $0xb2] sm:$0xff] }
 0x1b6   : > { %v3661_v50 = vunpack.i.h.bf16 %v3659_v46  ;;  %v3660_v54 = vunpack.i.l.bf16 %v3659_v46  ;;  %v3654_v55 = vpop.permute.xlu0 %3653  ;;  %v2360_v57 = vsel %vm1601_vm9, %v2344_v51, %v3636_v22  ;;  %v5035_v46 = vpack.i.bf16 %v3221_v43, %v3220_v25  ;;  %v3192_v62 = vld [vmem:[%s4589_s23 + $0xd8] sm:$0xff] }
 0x1b7   : > { %3948 = vrot.lane.b32.xlu1 %v4840_v37, %s4222_s19  ;;  %3380 = vmatprep.mubr.msk.bf16.mxu0 %vm1680_vm12, %v1652_v48  ;;  %v3656_v5 = vunpack.i.h.bf16 %v3654_v55  ;;  %v3655_v29 = vunpack.i.l.bf16 %v3654_v55 }
 0x1b8   : > { %3943 = vrot.lane.b32.xlu0 %v4848_v41, %s4221_s12  ;;  %v2389_v4 = vsel %vm1635_vm11, %v2373_v58, %v3660_v54  ;;  %v2390_v60 = vsel %vm1635_vm11, %v2374_v47, %v3661_v50  ;;  %v3142_v47 = vld [vmem:[%s4589_s23 + $0xc0] sm:$0xff] }
 0x1b9   : > { %v3669_v0 = vpop.permute.xlu1 %3668  ;;  %v2405_v1 = vpack.c.bf16 %v2390_v60, %v2389_v4  ;;  %v2375_v38 = vsel %vm1618_vm10, %v2359_v61, %v3655_v29  ;;  %v2376_v6 = vsel %vm1618_vm10, %v2360_v57, %v3656_v5  ;;  %v3159_v4 = vld [vmem:[%s4589_s23 + $0xc9] sm:$0xff] }
 0x1ba   : > { %v3671_v52 = vunpack.i.h.bf16 %v3669_v0  ;;  %v3670_v49 = vunpack.i.l.bf16 %v3669_v0  ;;  %v4996_v2 = vpop.permute.xlu0 %3663  ;;  %v3174_v60 = vld [vmem:[%s4589_s23 + $0xc2] sm:$0xff] }
 0x1bb   : > { %3958 = vrot.lane.b32.xlu1 %v4840_v37, %s4221_s12  ;;  %3402 = vmatprep.mubr.msk.bf16.mxu1 %vm1680_vm12, %v2405_v1  ;;  %v3193_v0 = vld [vmem:[%s4589_s23 + $0xe0] sm:$0xff]  ;;  %v3666_v1 = vunpack.i.h.bf16 %v4996_v2  ;;  %v3665_v22 = vunpack.i.l.bf16 %v4996_v2  ;;  %v5108_v5 = vpack.i.bf16 %v3175_v63, %v3174_v60 }
 0x1bc   : > { %v1638_v32 = vsel %vm1635_vm11, %v1621_v28, %v3670_v49  ;;  %v1639_v33 = vsel %vm1635_vm11, %v1622_v30, %v3671_v52  ;;  %3953 = vrot.lane.b32.xlu0 %v4848_v41, %s4220_s30  ;;  %v3208_v49 = vld [vmem:[%s4589_s23 + $0xd9] sm:$0xff]  ;;  %v5106_v30 = vpack.i.bf16 %v3159_v4, %v3158_v15  ;;  %v5114_v2 = vpack.i.bf16 %v3193_v0, %v3192_v62 }
 0x1bd   : > { %v1653_v34 = vpack.c.bf16 %v1639_v33, %v1638_v32  ;;  %v3679_v36 = vpop.permute.xlu1 %3678  ;;  %v1522_v51 = vsel %vm1516_vm4, %v4639_v10, %v3666_v1 }
 0x1be   : > { %v3681_v20 = vunpack.i.h.bf16 %v3679_v36  ;;  %v3680_v59 = vunpack.i.l.bf16 %v3679_v36  ;;  %v5015_v35 = vpop.permute.xlu0 %3673 }
 0x1bf   : > { %3968 = vrot.lane.b32.xlu1 %v4846_v40, %s4223_s20  ;;  %3381 = vmatmul.mubr.msk.bf16.vlgmr.msra.gmra.mxu0 %vm1680_vm12, %v1653_v34  ;;  %v3676_v23 = vunpack.i.h.bf16 %v5015_v35  ;;  %v3675_v29 = vunpack.i.l.bf16 %v5015_v35  ;;  %v1521_v34 = vsel %vm1516_vm4, %v4636_v9, %v3665_v22 }
 0x1c0   : > { %v2391_v39 = vsel %vm1635_vm11, %v2375_v38, %v3680_v59  ;;  %v2392_v42 = vsel %vm1635_vm11, %v2376_v6, %v3681_v20  ;;  %3963 = vrot.lane.b32.xlu0 %v4855_v45, %s4222_s19 }
 0x1c1   : > { %v2406_v7 = vpack.c.bf16 %v2392_v42, %v2391_v39  ;;  %v5028_v44 = vpop.permute.xlu1 %3688  ;;  %v2282_v36 = vsel %vm1516_vm4, %v3676_v23, %v4654_v13  ;;  %v2281_v9 = vsel %vm1516_vm4, %v3675_v29, %v4651_v12 }
 0x1c2   : > { %v5030_v8 = vpop.permute.xlu0 %3683  ;;  %v3690_v31 = vunpack.i.l.bf16 %v5028_v44  ;;  %v3691_v21 = vunpack.i.h.bf16 %v5028_v44 }
 0x1c3   : > { %3978 = vrot.lane.b32.xlu1 %v4846_v40, %s4222_s19  ;;  %3403 = vmatmul.mubr.msk.bf16.vlgmr.msra.gmra.mxu1 %vm1680_vm12, %v2406_v7  ;;  %v3686_v32 = vunpack.i.h.bf16 %v5030_v8  ;;  %v3685_v33 = vunpack.i.l.bf16 %v5030_v8 }
 0x1c4   : > { %3973 = vrot.lane.b32.xlu0 %v4855_v45, %s4221_s12  ;;  %v1538_v10 = vsel %vm1533_vm5, %v1521_v34, %v3690_v31  ;;  %v1539_v42 = vsel %vm1533_vm5, %v1522_v51, %v3691_v21 }
 0x1c5   : > { %v5039_v48 = vpop.permute.xlu1 %3698  ;;  %v1524_v25 = vsel %vm1516_vm4, %v4674_v19, %v3686_v32  ;;  %v1523_v43 = vsel %vm1516_vm4, %v4671_v18, %v3685_v33 }
 0x1c6   : > { %v5041_v50 = vpop.permute.xlu0 %3693  ;;  %v3700_v61 = vunpack.i.l.bf16 %v5039_v48  ;;  %v3701_v20 = vunpack.i.h.bf16 %v5039_v48 }
 0x1c7   : > { %3988 = vrot.lane.b32.xlu1 %v5035_v46, %s4223_s20  ;;  %v3696_v59 = vunpack.i.h.bf16 %v5041_v50  ;;  %v3695_v35 = vunpack.i.l.bf16 %v5041_v50 }
 0x1c8   : > { %3983 = vrot.lane.b32.xlu0 %v4840_v37, %s4215_s24  ;;  %v2297_v12 = vsel %vm1533_vm5, %v2281_v9, %v3700_v61  ;;  %v2298_v19 = vsel %vm1533_vm5, %v2282_v36, %v3701_v20 }
 0x1c9   : > { %v5047_v54 = vpop.permute.xlu1 %3708  ;;  %v2284_v18 = vsel %vm1516_vm4, %v3696_v59, %v4699_v27  ;;  %v2283_v50 = vsel %vm1516_vm4, %v3695_v35, %v4696_v26 }
 0x1ca   : > { %v5049_v55 = vpop.permute.xlu0 %3703  ;;  %v3710_v38 = vunpack.i.l.bf16 %v5047_v54  ;;  %v3711_v13 = vunpack.i.h.bf16 %v5047_v54 }
 0x1cb   : > { %3998 = vrot.lane.b32.xlu1 %v5035_v46, %s4222_s19  ;;  %v3705_v39 = vunpack.i.l.bf16 %v5049_v55  ;;  %v3706_v7 = vunpack.i.h.bf16 %v5049_v55 }
 0x1cc   : > { %3993 = vrot.lane.b32.xlu0 %v4826_v24, %s4217_s27  ;;  %v1555_v54 = vsel %vm1550_vm6, %v1538_v10, %v3710_v38 }
 0x1cd   : > { %v5055_v16 = vpop.permute.xlu1 %3718  ;;  %v1541_v27 = vsel %vm1533_vm5, %v1524_v25, %v3706_v7 }
 0x1ce   : > { %v5057_v11 = vpop.permute.xlu0 %3713  ;;  %v3721_v44 = vunpack.i.h.bf16 %v5055_v16  ;;  %v3720_v8 = vunpack.i.l.bf16 %v5055_v16  ;;  %v1540_v16 = vsel %vm1533_vm5, %v1523_v43, %v3705_v39 }
 0x1cf   : > { %4008 = vrot.lane.b32.xlu1 %v4846_v40, %s4216_s26 }
 0x1d0   : > { %4003 = vrot.lane.b32.xlu0 %v4855_v45, %s4215_s24  ;;  %v2313_v63 = vsel %vm1550_vm6, %v2297_v12, %v3720_v8 }
 0x1d1   : > { %v5063_v37 = vpop.permute.xlu1 %3728 }
 0x1d2   : > { %v5065_v56 = vpop.permute.xlu0 %3723  ;;  %v3730_v15 = vunpack.i.l.bf16 %v5063_v37  ;;  %v3731_v4 = vunpack.i.h.bf16 %v5063_v37 }
 0x1d3   : > { %4018 = vrot.lane.b32.xlu1 %v4846_v40, %s4215_s24  ;;  %v3143_v40 = vld [vmem:[%s4589_s23 + $0xc8] sm:$0xff]  ;;  %v3726_v26 = vunpack.i.h.bf16 %v5065_v56  ;;  %v3725_v60 = vunpack.i.l.bf16 %v5065_v56 }
 0x1d4   : > { %4013 = vrot.lane.b32.xlu0 %v4848_v41, %s4217_s27  ;;  %v5093_v17 = vpack.i.bf16 %v3143_v40, %v3142_v47  ;;  %v1556_v47 = vsel %vm1550_vm6, %v1539_v42, %v3711_v13  ;;  %v3716_v40 = vunpack.i.h.bf16 %v5057_v11  ;;  %v1572_v29 = vsel %vm1567_vm7, %v1555_v54, %v3730_v15 }
 0x1d5   : > { %v5071_v24 = vpop.permute.xlu1 %3738  ;;  %v1557_v32 = vsel %vm1550_vm6, %v1540_v16, %v3725_v60 }
 0x1d6   : > { %v5073_v14 = vpop.permute.xlu0 %3733  ;;  %v3740_v0 = vunpack.i.l.bf16 %v5071_v24  ;;  %v3741_v22 = vunpack.i.h.bf16 %v5071_v24  ;;  %v1573_v24 = vsel %vm1567_vm7, %v1556_v47, %v3731_v4 }
 0x1d7   : > { %4028 = vrot.lane.b32.xlu1 %v4848_v41, %s5838_s28  ;;  %v3736_v37 = vunpack.i.h.bf16 %v5073_v14  ;;  %v3735_v23 = vunpack.i.l.bf16 %v5073_v14  ;;  %v1558_v14 = vsel %vm1550_vm6, %v1541_v27, %v3726_v26 }
 0x1d8   : > { %4023 = vrot.lane.b32.xlu0 %v5035_v46, %s4216_s26  ;;  %v2329_v51 = vsel %vm1567_vm7, %v2313_v63, %v3740_v0 }
 0x1d9   : > { %v5079_v58 = vpop.permute.xlu1 %3748 }
 0x1da   : > { %v5083_v3 = vpop.permute.xlu0 %3743  ;;  %v3750_v56 = vunpack.i.l.bf16 %v5079_v58  ;;  %v3751_v31 = vunpack.i.h.bf16 %v5079_v58 }
 0x1db   : > { %4038 = vrot.lane.b32.xlu1 %v4848_v41, %s4216_s26  ;;  %v3209_v41 = vld [vmem:[%s4589_s23 + $0xe1] sm:$0xff]  ;;  %v3745_v21 = vunpack.i.l.bf16 %v5083_v3  ;;  %v3746_v33 = vunpack.i.h.bf16 %v5083_v3 }
 0x1dc   : > { %4033 = vrot.lane.b32.xlu0 %v5035_v46, %s4215_s24  ;;  %v5121_v53 = vpack.i.bf16 %v3209_v41, %v3208_v49  ;;  %v2300_v41 = vsel %vm1533_vm5, %v2284_v18, %v3716_v40  ;;  %v1589_v3 = vsel %vm1584_vm8, %v1572_v29, %v3750_v56  ;;  %v1590_v38 = vsel %vm1584_vm8, %v1573_v24, %v3751_v31 }
 0x1dd   : > { %v5100_v52 = vpop.permute.xlu1 %3758  ;;  %v5210_v59 = vsel %vm1550_vm6, %v2300_v41, %v3736_v37  ;;  %v1574_v9 = vsel %vm1567_vm7, %v1557_v32, %v3745_v21 }
 0x1de   : > { %v5104_v28 = vpop.permute.xlu0 %3753  ;;  %v3760_v58 = vunpack.i.l.bf16 %v5100_v52  ;;  %v3761_v39 = vunpack.i.h.bf16 %v5100_v52 }
 0x1df   : > { %4048 = vrot.lane.b32.xlu1 %v4855_v45, %s5839_s29  ;;  %v3756_v42 = vunpack.i.h.bf16 %v5104_v28  ;;  %v3755_v25 = vunpack.i.l.bf16 %v5104_v28 }
 0x1e0   : > { %4043 = vrot.lane.b32.xlu0 %v5093_v17, %s5838_s28  ;;  %v2345_v43 = vsel %vm1584_vm8, %v2329_v51, %v3760_v58 }
 0x1e1   : > { %v5130_v57 = vpop.permute.xlu1 %3768 }
 0x1e2   : > { %v5136_v6 = vpop.permute.xlu0 %3763  ;;  %v3771_v34 = vunpack.i.h.bf16 %v5130_v57  ;;  %v3770_v36 = vunpack.i.l.bf16 %v5130_v57  ;;  %v1575_v57 = vsel %vm1567_vm7, %v1558_v14, %v3746_v33 }
 0x1e3   : > { %4058 = vrot.lane.b32.xlu1 %v4855_v45, %s5838_s28  ;;  %v3715_v45 = vunpack.i.l.bf16 %v5057_v11  ;;  %v2314_v11 = vsel %vm1550_vm6, %v2298_v19, %v3721_v44  ;;  %v3765_v44 = vunpack.i.l.bf16 %v5136_v6  ;;  %v3766_v15 = vunpack.i.h.bf16 %v5136_v6 }
 0x1e4   : > { %4053 = vrot.lane.b32.xlu0 %v5093_v17, %s4216_s26  ;;  %v2330_v61 = vsel %vm1567_vm7, %v2314_v11, %v3741_v22  ;;  %v1606_v7 = vsel %vm1601_vm9, %v1589_v3, %v3770_v36  ;;  %v1607_v12 = vsel %vm1601_vm9, %v1590_v38, %v3771_v34 }
 0x1e5   : > { %v5157_v48 = vpop.permute.xlu1 %3778  ;;  %v2299_v62 = vsel %vm1533_vm5, %v2283_v50, %v3715_v45  ;;  %v2346_v40 = vsel %vm1584_vm8, %v2330_v61, %v3761_v39  ;;  %v1591_v4 = vsel %vm1584_vm8, %v1574_v9, %v3765_v44 }
 0x1e6   : > { %v5165_v55 = vpop.permute.xlu0 %3773  ;;  %v5207_v20 = vsel %vm1550_vm6, %v2299_v62, %v3735_v23  ;;  %v3781_v45 = vunpack.i.h.bf16 %v5157_v48  ;;  %v3780_v52 = vunpack.i.l.bf16 %v5157_v48 }
 0x1e7   : > { %4068 = vrot.lane.b32.xlu1 %v5035_v46, %s4220_s30  ;;  %v3776_v41 = vunpack.i.h.bf16 %v5165_v55  ;;  %v3775_v21 = vunpack.i.l.bf16 %v5165_v55  ;;  %v2331_v9 = vsel %vm1567_vm7, %v5207_v20, %v3755_v25 }
 0x1e8   : > { %4063 = vrot.lane.b32.xlu0 %v5106_v30, %s5839_s29  ;;  %v2362_v62 = vsel %vm1601_vm9, %v2346_v40, %v3781_v45  ;;  %v3224_v45 = vld [vmem:[%s4589_s23 + $0xda] sm:$0xff] }
 0x1e9   : > { %v3789_v1 = vpop.permute.xlu1 %3788 }
 0x1ea   : > { %v5187_v49 = vpop.permute.xlu0 %3783  ;;  %v3791_v10 = vunpack.i.h.bf16 %v3789_v1  ;;  %v3790_v13 = vunpack.i.l.bf16 %v3789_v1 }
 0x1eb   : > { %4078 = vrot.lane.b32.xlu1 %v5035_v46, %s5839_s29  ;;  %v3786_v26 = vunpack.i.h.bf16 %v5187_v49  ;;  %v3785_v60 = vunpack.i.l.bf16 %v5187_v49  ;;  %v1592_v49 = vsel %vm1584_vm8, %v1575_v57, %v3766_v15  ;;  %v2347_v57 = vsel %vm1584_vm8, %v2331_v9, %v3775_v21 }
 0x1ec   : > { %4073 = vrot.lane.b32.xlu0 %v5106_v30, %s5838_s28  ;;  %v1623_v28 = vsel %vm1618_vm10, %v1606_v7, %v3790_v13  ;;  %v1624_v54 = vsel %vm1618_vm10, %v1607_v12, %v3791_v10 }
 0x1ed   : > { %v3799_v46 = vpop.permute.xlu1 %3798  ;;  %v1608_v24 = vsel %vm1601_vm9, %v1591_v4, %v3785_v60  ;;  %v1609_v32 = vsel %vm1601_vm9, %v1592_v49, %v3786_v26 }
 0x1ee   : > { %v5213_v35 = vpop.permute.xlu0 %3793  ;;  %v3801_v47 = vunpack.i.h.bf16 %v3799_v46  ;;  %v3800_v16 = vunpack.i.l.bf16 %v3799_v46 }
 0x1ef   : > { %4088 = vrot.lane.b32.xlu1 %v5093_v17, %s4221_s12  ;;  %v3796_v51 = vunpack.i.h.bf16 %v5213_v35  ;;  %v3795_v58 = vunpack.i.l.bf16 %v5213_v35  ;;  %v2332_v35 = vsel %vm1567_vm7, %v5210_v59, %v3756_v42 }
 0x1f0   : > { %4083 = vrot.lane.b32.xlu0 %v5108_v5, %s4220_s30  ;;  %v2378_v37 = vsel %vm1618_vm10, %v2362_v62, %v3801_v47 }
 0x1f1   : > { %v3809_v8 = vpop.permute.xlu1 %3808  ;;  %v2363_v20 = vsel %vm1601_vm9, %v2347_v57, %v3795_v58  ;;  %v4162_v57 = vld [vmem:[%s4589_s23 + $0x80] sm:$0xff] }
 0x1f2   : > { %v3811_v19 = vunpack.i.h.bf16 %v3809_v8  ;;  %v3810_v18 = vunpack.i.l.bf16 %v3809_v8  ;;  %v3804_v50 = vpop.permute.xlu0 %3803 }
 0x1f3   : > { %4098 = vrot.lane.b32.xlu1 %v5093_v17, %s4220_s30  ;;  %v2361_v17 = vsel %vm1601_vm9, %v2345_v43, %v3780_v52  ;;  %v3806_v23 = vunpack.i.h.bf16 %v3804_v50  ;;  %v3805_v56 = vunpack.i.l.bf16 %v3804_v50  ;;  %v3225_v52 = vld [vmem:[%s4589_s23 + $0xe2] sm:$0xff] }
 0x1f4   : > { %v1640_v27 = vsel %vm1635_vm11, %v1623_v28, %v3810_v18  ;;  %v1641_v48 = vsel %vm1635_vm11, %v1624_v54, %v3811_v19  ;;  %4093 = vrot.lane.b32.xlu0 %v5108_v5, %s5839_s29  ;;  %v2377_v22 = vsel %vm1618_vm10, %v2361_v17, %v3800_v16  ;;  %v4147_v28 = vpack.i.bf16 %v3225_v52, %v3224_v45  ;;  %v4165_v45 = vld [vmem:[%s4589_s23 + $0x79] sm:$0xff]  ;;  %s3282_s29 = sshll.u32 %s4196_s13, 7 }
 0x1f5   : > { %v1654_v63 = vpack.c.bf16 %v1641_v48, %v1640_v27  ;;  %v3819_v11 = vpop.permute.xlu1 %3818  ;;  %v1625_v61 = vsel %vm1618_vm10, %v1608_v24, %v3805_v56  ;;  %v1626_v3 = vsel %vm1618_vm10, %v1609_v32, %v3806_v23  ;;  %v3259_v48 = vld [vmem:[%s5829_s7 + $0x2] sm:$0x3]  ;;  %s5720_s27 = scalar_lea.vmem %s4315_s25, %s3282_s29 }
 0x1f6   : > { %v3821_v6 = vunpack.i.h.bf16 %v3819_v11  ;;  %v3820_v0 = vunpack.i.l.bf16 %v3819_v11  ;;  %v3814_v1 = vpop.permute.xlu0 %3813  ;;  %3460 = vmatprep.subr.msk.bf16.mxu0 %vm1705_vm3, %v3259_v48  ;;  %v2657_v4 = vsel %vm1705_vm3, %v3259_v48, 0  ;;  %v4159_v24 = vld [vmem:[%s4589_s23 + $0x60] sm:$0xff] }
 0x1f7   : > { %4108 = vrot.lane.b32.xlu1 %v5106_v30, %s4222_s19  ;;  %3384 = vmatprep.mubr.msk.bf16.mxu0 %vm1680_vm12, %v1654_v63  ;;  %v3816_v38 = vunpack.i.h.bf16 %v3814_v1  ;;  %v3815_v55 = vunpack.i.l.bf16 %v3814_v1 }
 0x1f8   : > { %v2393_v29 = vsel %vm1635_vm11, %v2377_v22, %v3820_v0  ;;  %v2394_v31 = vsel %vm1635_vm11, %v2378_v37, %v3821_v6  ;;  %4103 = vrot.lane.b32.xlu0 %v5114_v2, %s4221_s12  ;;  %3419 = vmatpush3.bf16.msra.mxu0 %v2657_v4 }
 0x1f9   : > { %v2407_v14 = vpack.c.bf16 %v2394_v31, %v2393_v29  ;;  %v3829_v33 = vpop.permute.xlu1 %3828  ;;  %v2379_v12 = vsel %vm1618_vm10, %v2363_v20, %v3815_v55  ;;  %v4158_v31 = vld [vmem:[%s4589_s23 + $0x68] sm:$0xff] }
 0x1fa   : > { %v3831_v34 = vunpack.i.h.bf16 %v3829_v33  ;;  %v3830_v36 = vunpack.i.l.bf16 %v3829_v33  ;;  %v5262_v46 = vpop.permute.xlu0 %3823 }
 0x1fb   : > { %4118 = vrot.lane.b32.xlu1 %v5106_v30, %s4221_s12  ;;  %3406 = vmatprep.mubr.msk.bf16.mxu1 %vm1680_vm12, %v2407_v14  ;;  %v2348_v30 = vsel %vm1584_vm8, %v2332_v35, %v3776_v41  ;;  %v3826_v6 = vunpack.i.h.bf16 %v5262_v46  ;;  %v3825_v0 = vunpack.i.l.bf16 %v5262_v46  ;;  %v4160_v14 = vld [vmem:[%s4589_s23 + $0x69] sm:$0xff] }
 0x1fc   : > { %v1642_v10 = vsel %vm1635_vm11, %v1625_v61, %v3830_v36  ;;  %v1643_v13 = vsel %vm1635_vm11, %v1626_v3, %v3831_v34  ;;  %4113 = vrot.lane.b32.xlu0 %v5114_v2, %s4220_s30  ;;  %v2364_v25 = vsel %vm1601_vm9, %v2348_v30, %v3796_v51 }
 0x1fd   : > { %v1655_v39 = vpack.c.bf16 %v1643_v13, %v1642_v10  ;;  %v3839_v43 = vpop.permute.xlu1 %3838  ;;  %v2380_v2 = vsel %vm1618_vm10, %v2364_v25, %v3816_v38  ;;  %v1526_v21 = vsel %vm1516_vm4, %v4158_v31, %v3826_v6  ;;  %v1525_v32 = vsel %vm1516_vm4, %v4159_v24, %v3825_v0  ;;  %v4161_v38 = vld [vmem:[%s4589_s23 + $0x61] sm:$0xff] }
 0x1fe   : > { %v3841_v59 = vunpack.i.h.bf16 %v3839_v43  ;;  %v3840_v42 = vunpack.i.l.bf16 %v3839_v43  ;;  %v5281_v7 = vpop.permute.xlu0 %3833 }
 0x1ff   : > { %4128 = vrot.lane.b32.xlu1 %v5108_v5, %s4223_s20  ;;  %3385 = vmatmul.mubr.msk.bf16.gmra.mxu0 %vm1680_vm12, %v1655_v39  ;;  %v3836_v1 = vunpack.i.h.bf16 %v5281_v7  ;;  %v3835_v23 = vunpack.i.l.bf16 %v5281_v7  ;;  %v4163_v39 = vld [vmem:[%s4589_s23 + $0x78] sm:$0xff] }
 0x200   : > { %v2395_v44 = vsel %vm1635_vm11, %v2379_v12, %v3840_v42  ;;  %v2396_v8 = vsel %vm1635_vm11, %v2380_v2, %v3841_v59  ;;  %4123 = vrot.lane.b32.xlu0 %v5121_v53, %s4222_s19 }
 0x201   : > { %v2408_v19 = vpack.c.bf16 %v2396_v8, %v2395_v44  ;;  %v3849_v18 = vpop.permute.xlu1 %3848  ;;  %v2286_v33 = vsel %vm1516_vm4, %v3836_v1, %v4160_v14  ;;  %v2285_v55 = vsel %vm1516_vm4, %v3835_v23, %v4161_v38  ;;  %v4164_v44 = vld [vmem:[%s4589_s23 + $0x81] sm:$0xff] }
 0x202   : > { %v3844_v50 = vpop.permute.xlu0 %3843  ;;  %v3850_v56 = vunpack.i.l.bf16 %v3849_v18  ;;  %v3851_v49 = vunpack.i.h.bf16 %v3849_v18 }
 0x203   : > { %4138 = vrot.lane.b32.xlu1 %v5108_v5, %s4222_s19  ;;  %3407 = vmatmul.mubr.msk.bf16.gmra.mxu1 %vm1680_vm12, %v2408_v19  ;;  %v1876_v5 = vld [vmem:[%s5829_s7] sm:$0x3]  ;;  %v3846_v41 = vunpack.i.h.bf16 %v3844_v50  ;;  %v3845_v29 = vunpack.i.l.bf16 %v3844_v50 }
 0x204   : > { %4133 = vrot.lane.b32.xlu0 %v5121_v53, %s4221_s12  ;;  %3461 = vmatprep.subr.msk.bf16.mxu1 %vm1705_vm3, %v1876_v5  ;;  %v2781_v53 = vsel %vm1705_vm3, %v1876_v5, 0  ;;  %v1542_v9 = vsel %vm1533_vm5, %v1525_v32, %v3850_v56  ;;  %v1543_v13 = vsel %vm1533_vm5, %v1526_v21, %v3851_v49 }
 0x205   : > { %v5299_v54 = vpop.permute.xlu1 %3858  ;;  %3437 = vmatpush3.bf16.msra.mxu1 %v2781_v53  ;;  %v1528_v30 = vsel %vm1516_vm4, %v4162_v57, %v3846_v41  ;;  %v1527_v43 = vsel %vm1516_vm4, %v4163_v39, %v3845_v29 }
 0x206   : > { %v5301_v47 = vpop.permute.xlu0 %3853  ;;  %v3860_v51 = vunpack.i.l.bf16 %v5299_v54  ;;  %v3861_v34 = vunpack.i.h.bf16 %v5299_v54 }
 0x207   : > { %4148 = vrot.lane.b32.xlu1 %v4147_v28, %s4222_s19  ;;  %v3856_v36 = vunpack.i.h.bf16 %v5301_v47  ;;  %v3855_v46 = vunpack.i.l.bf16 %v5301_v47 }
 0x208   : > { %4143 = vrot.lane.b32.xlu0 %v4147_v28, %s4223_s20  ;;  %v2301_v25 = vsel %vm1533_vm5, %v2285_v55, %v3860_v51  ;;  %v2302_v2 = vsel %vm1533_vm5, %v2286_v33, %v3861_v34 }
 0x209   : > { %v5305_v16 = vpop.permute.xlu1 %3868  ;;  %v2288_v8 = vsel %vm1516_vm4, %v3856_v36, %v4164_v44  ;;  %v2287_v52 = vsel %vm1516_vm4, %v3855_v46, %v4165_v45 }
 0x20a   : > { %v5307_v40 = vpop.permute.xlu0 %3863  ;;  %v3870_v61 = vunpack.i.l.bf16 %v5305_v16  ;;  %v3871_v35 = vunpack.i.h.bf16 %v5305_v16 }
 0x20b   : > { %v3865_v10 = vunpack.i.l.bf16 %v5307_v40  ;;  %v3866_v20 = vunpack.i.h.bf16 %v5307_v40 }
 0x20c   : > { %v1559_v19 = vsel %vm1550_vm6, %v1542_v9, %v3870_v61  ;;  %v1560_v50 = vsel %vm1550_vm6, %v1543_v13, %v3871_v35 }
 0x20d   : > { %v5314_v15 = vpop.permute.xlu1 %3878  ;;  %v1544_v28 = vsel %vm1533_vm5, %v1527_v43, %v3865_v10  ;;  %v1545_v16 = vsel %vm1533_vm5, %v1528_v30, %v3866_v20 }
 0x20e   : > { %v5316_v27 = vpop.permute.xlu0 %3873  ;;  %v3881_v59 = vunpack.i.h.bf16 %v5314_v15  ;;  %v3880_v42 = vunpack.i.l.bf16 %v5314_v15 }
 0x20f   : > { %v3875_v7 = vunpack.i.l.bf16 %v5316_v27  ;;  %v3876_v54 = vunpack.i.h.bf16 %v5316_v27 }
 0x210   : > { %v2317_v15 = vsel %vm1550_vm6, %v2301_v25, %v3880_v42  ;;  %v2318_v48 = vsel %vm1550_vm6, %v2302_v2, %v3881_v59 }
 0x211   : > { %v5323_v26 = vpop.permute.xlu1 %3888  ;;  %v2303_v4 = vsel %vm1533_vm5, %v2287_v52, %v3875_v7 }
 0x212   : > { %v5325_v60 = vpop.permute.xlu0 %3883  ;;  %v3890_v47 = vunpack.i.l.bf16 %v5323_v26  ;;  %v3891_v40 = vunpack.i.h.bf16 %v5323_v26 }
 0x213   : > { %v3886_v5 = vunpack.i.h.bf16 %v5325_v60  ;;  %v3885_v53 = vunpack.i.l.bf16 %v5325_v60  ;;  %v2304_v60 = vsel %vm1533_vm5, %v2288_v8, %v3876_v54 }
 0x214   : > { %v1576_v49 = vsel %vm1567_vm7, %v1559_v19, %v3890_v47  ;;  %v1577_v31 = vsel %vm1567_vm7, %v1560_v50, %v3891_v40 }
 0x215   : > { %v5327_v63 = vpop.permute.xlu1 %3898  ;;  %v1562_v21 = vsel %vm1550_vm6, %v1545_v16, %v3886_v5 }
 0x216   : > { %v5329_v11 = vpop.permute.xlu0 %3893  ;;  %v3900_v6 = vunpack.i.l.bf16 %v5327_v63  ;;  %v3901_v27 = vunpack.i.h.bf16 %v5327_v63  ;;  %v1561_v63 = vsel %vm1550_vm6, %v1544_v28, %v3885_v53 }
 0x217   : > { %v3896_v1 = vunpack.i.h.bf16 %v5329_v11  ;;  %v3895_v23 = vunpack.i.l.bf16 %v5329_v11 }
 0x218   : > { %v2333_v24 = vsel %vm1567_vm7, %v2317_v15, %v3900_v6 }
 0x219   : > { %v5331_v17 = vpop.permute.xlu1 %3908  ;;  %v5415_v34 = vsel %vm1550_vm6, %v2303_v4, %v3895_v23  ;;  %v5418_v36 = vsel %vm1550_vm6, %v2304_v60, %v3896_v1 }
 0x21a   : > { %v5333_v62 = vpop.permute.xlu0 %3903  ;;  %v3910_v26 = vunpack.i.l.bf16 %v5331_v17  ;;  %v3911_v41 = vunpack.i.h.bf16 %v5331_v17  ;;  %v2334_v17 = vsel %vm1567_vm7, %v2318_v48, %v3901_v27 }
 0x21b   : > { %v3905_v29 = vunpack.i.l.bf16 %v5333_v62  ;;  %v3906_v11 = vunpack.i.h.bf16 %v5333_v62 }
 0x21c   : > { %v1593_v46 = vsel %vm1584_vm8, %v1576_v49, %v3910_v26  ;;  %v1594_v61 = vsel %vm1584_vm8, %v1577_v31, %v3911_v41 }
 0x21d   : > { %v5338_v22 = vpop.permute.xlu1 %3918  ;;  %v1578_v38 = vsel %vm1567_vm7, %v1561_v63, %v3905_v29 }
 0x21e   : > { %v5340_v37 = vpop.permute.xlu0 %3913  ;;  %v3920_v32 = vunpack.i.l.bf16 %v5338_v22  ;;  %v3921_v35 = vunpack.i.h.bf16 %v5338_v22 }
 0x21f   : > { %v3916_v10 = vunpack.i.h.bf16 %v5340_v37  ;;  %v3915_v13 = vunpack.i.l.bf16 %v5340_v37 }
 0x220   : > { %v2349_v57 = vsel %vm1584_vm8, %v2333_v24, %v3920_v32  ;;  %v2350_v45 = vsel %vm1584_vm8, %v2334_v17, %v3921_v35 }
 0x221   : > { %v5350_v58 = vpop.permute.xlu1 %3928  ;;  %v2336_v17 = vsel %vm1567_vm7, %v5418_v36, %v3916_v10 }
 0x222   : > { %v5356_v3 = vpop.permute.xlu0 %3923  ;;  %v3931_v14 = vunpack.i.h.bf16 %v5350_v58  ;;  %v3930_v33 = vunpack.i.l.bf16 %v5350_v58  ;;  %v1579_v58 = vsel %vm1567_vm7, %v1562_v21, %v3906_v11 }
 0x223   : > { %v3925_v43 = vunpack.i.l.bf16 %v5356_v3  ;;  %v3926_v52 = vunpack.i.h.bf16 %v5356_v3 }
 0x224   : > { %v1610_v30 = vsel %vm1601_vm9, %v1593_v46, %v3930_v33  ;;  %v1611_v39 = vsel %vm1601_vm9, %v1594_v61, %v3931_v14 }
 0x225   : > { %v5373_v12 = vpop.permute.xlu1 %3938  ;;  %v1595_v28 = vsel %vm1584_vm8, %v1578_v38, %v3925_v43  ;;  %v1596_v27 = vsel %vm1584_vm8, %v1579_v58, %v3926_v52 }
 0x226   : > { %v5381_v18 = vpop.permute.xlu0 %3933  ;;  %v3941_v25 = vunpack.i.h.bf16 %v5373_v12  ;;  %v3940_v59 = vunpack.i.l.bf16 %v5373_v12 }
 0x227   : > { %v3936_v1 = vunpack.i.h.bf16 %v5381_v18 }
 0x228   : > { %v2365_v40 = vsel %vm1601_vm9, %v2349_v57, %v3940_v59  ;;  %v2366_v5 = vsel %vm1601_vm9, %v2350_v45, %v3941_v25 }
 0x229   : > { %v3949_v0 = vpop.permute.xlu1 %3948  ;;  %v2352_v38 = vsel %vm1584_vm8, %v2336_v17, %v3936_v1 }
 0x22a   : > { %v5399_v56 = vpop.permute.xlu0 %3943  ;;  %v3951_v55 = vunpack.i.h.bf16 %v3949_v0  ;;  %v3950_v9 = vunpack.i.l.bf16 %v3949_v0 }
 0x22b   : > { %v3946_v12 = vunpack.i.h.bf16 %v5399_v56  ;;  %v3945_v54 = vunpack.i.l.bf16 %v5399_v56  ;;  %v3935_v56 = vunpack.i.l.bf16 %v5381_v18  ;;  %v2335_v18 = vsel %vm1567_vm7, %v5415_v34, %v3915_v13 }
 0x22c   : > { %v1627_v2 = vsel %vm1618_vm10, %v1610_v30, %v3950_v9  ;;  %v1628_v37 = vsel %vm1618_vm10, %v1611_v39, %v3951_v55 }
 0x22d   : > { %v3959_v51 = vpop.permute.xlu1 %3958  ;;  %v1612_v60 = vsel %vm1601_vm9, %v1595_v28, %v3945_v54  ;;  %v1613_v49 = vsel %vm1601_vm9, %v1596_v27, %v3946_v12  ;;  %v2351_v61 = vsel %vm1584_vm8, %v2335_v18, %v3935_v56  ;;  %v4169_v56 = vld [vmem:[%s4589_s23 + $0x91] sm:$0xff] }
 0x22e   : > { %v5421_v62 = vpop.permute.xlu0 %3953  ;;  %v3961_v44 = vunpack.i.h.bf16 %v3959_v51  ;;  %v3960_v8 = vunpack.i.l.bf16 %v3959_v51 }
 0x22f   : > { %v3956_v31 = vunpack.i.h.bf16 %v5421_v62  ;;  %v3955_v63 = vunpack.i.l.bf16 %v5421_v62 }
 0x230   : > { %v2381_v3 = vsel %vm1618_vm10, %v2365_v40, %v3960_v8  ;;  %v2382_v4 = vsel %vm1618_vm10, %v2366_v5, %v3961_v44 }
 0x231   : > { %v3969_v20 = vpop.permute.xlu1 %3968  ;;  %v2367_v58 = vsel %vm1601_vm9, %v2351_v61, %v3955_v63  ;;  %v2368_v35 = vsel %vm1601_vm9, %v2352_v38, %v3956_v31  ;;  %v4170_v63 = vld [vmem:[%s4589_s23 + $0xb0] sm:$0xff] }
 0x232   : > { %v3971_v42 = vunpack.i.h.bf16 %v3969_v20  ;;  %v3970_v7 = vunpack.i.l.bf16 %v3969_v20  ;;  %v3964_v22 = vpop.permute.xlu0 %3963 }
 0x233   : > { %v3966_v6 = vunpack.i.h.bf16 %v3964_v22  ;;  %v3965_v0 = vunpack.i.l.bf16 %v3964_v22 }
 0x234   : > { %v1644_v19 = vsel %vm1635_vm11, %v1627_v2, %v3970_v7  ;;  %v1645_v50 = vsel %vm1635_vm11, %v1628_v37, %v3971_v42 }
 0x235   : > { %v1656_v47 = vpack.c.bf16 %v1645_v50, %v1644_v19  ;;  %v3979_v16 = vpop.permute.xlu1 %3978  ;;  %v1629_v32 = vsel %vm1618_vm10, %v1612_v60, %v3965_v0  ;;  %v1630_v14 = vsel %vm1618_vm10, %v1613_v49, %v3966_v6  ;;  %v4167_v6 = vld [vmem:[%s4589_s23 + $0x90] sm:$0xff] }
 0x236   : > { %v3981_v53 = vunpack.i.h.bf16 %v3979_v16  ;;  %v3980_v15 = vunpack.i.l.bf16 %v3979_v16  ;;  %v3974_v48 = vpop.permute.xlu0 %3973 }
 0x237   : > { %3388 = vmatprep.mubr.msk.bf16.mxu0 %vm1680_vm12, %v1656_v47  ;;  %v3976_v33 = vunpack.i.h.bf16 %v3974_v48  ;;  %v3975_v51 = vunpack.i.l.bf16 %v3974_v48 }
 0x238   : > { %v2397_v23 = vsel %vm1635_vm11, %v2381_v3, %v3980_v15  ;;  %v2398_v26 = vsel %vm1635_vm11, %v2382_v4, %v3981_v53  ;;  %v4166_v3 = vld [vmem:[%s4589_s23 + $0x98] sm:$0xff] }
 0x239   : > { %v2409_v41 = vpack.c.bf16 %v2398_v26, %v2397_v23  ;;  %v3989_v29 = vpop.permute.xlu1 %3988  ;;  %v2383_v13 = vsel %vm1618_vm10, %v2367_v58, %v3975_v51  ;;  %v2384_v36 = vsel %vm1618_vm10, %v2368_v35, %v3976_v33  ;;  %v4168_v23 = vld [vmem:[%s4589_s23 + $0x99] sm:$0xff]  ;;  %v4173_v58 = vld [vmem:[%s4589_s23 + $0xa9] sm:$0xff] }
 0x23a   : > { %v3991_v21 = vunpack.i.h.bf16 %v3989_v29  ;;  %v3990_v11 = vunpack.i.l.bf16 %v3989_v29  ;;  %v3984_v24 = vpop.permute.xlu0 %3983 }
 0x23b   : > { %3410 = vmatprep.mubr.msk.bf16.mxu1 %vm1680_vm12, %v2409_v41  ;;  %v3986_v28 = vunpack.i.h.bf16 %v3984_v24  ;;  %v3985_v12 = vunpack.i.l.bf16 %v3984_v24 }
 0x23c   : > { %v1646_v46 = vsel %vm1635_vm11, %v1629_v32, %v3990_v11  ;;  %v1647_v62 = vsel %vm1635_vm11, %v1630_v14, %v3991_v21  ;;  %v4171_v32 = vld [vmem:[%s4589_s23 + $0xa8] sm:$0xff] }
 0x23d   : > { %v1657_v55 = vpack.c.bf16 %v1647_v62, %v1646_v46  ;;  %v3999_v9 = vpop.permute.xlu1 %3998  ;;  %v1530_v4 = vsel %vm1516_vm4, %v4166_v3, %v3986_v28  ;;  %v1529_v0 = vsel %vm1516_vm4, %v4167_v6, %v3985_v12 }
 0x23e   : > { %v4001_v57 = vunpack.i.h.bf16 %v3999_v9  ;;  %v4000_v30 = vunpack.i.l.bf16 %v3999_v9  ;;  %v3994_v34 = vpop.permute.xlu0 %3993 }
 0x23f   : > { %3389 = vmatmul.mubr.msk.bf16.gmra.mxu0 %vm1680_vm12, %v1657_v55  ;;  %v3996_v54 = vunpack.i.h.bf16 %v3994_v34  ;;  %v3995_v47 = vunpack.i.l.bf16 %v3994_v34  ;;  %v4172_v55 = vld [vmem:[%s4589_s23 + $0xb1] sm:$0xff] }
 0x240   : > { %v2399_v10 = vsel %vm1635_vm11, %v2383_v13, %v4000_v30  ;;  %v2400_v39 = vsel %vm1635_vm11, %v2384_v36, %v4001_v57 }
 0x241   : > { %v2410_v43 = vpack.c.bf16 %v2400_v39, %v2399_v10  ;;  %v4009_v20 = vpop.permute.xlu1 %4008  ;;  %v2290_v26 = vsel %vm1516_vm4, %v3996_v54, %v4168_v23  ;;  %v2289_v60 = vsel %vm1516_vm4, %v3995_v47, %v4169_v56 }
 0x242   : > { %v4004_v25 = vpop.permute.xlu0 %4003  ;;  %v4011_v16 = vunpack.i.h.bf16 %v4009_v20  ;;  %v4010_v40 = vunpack.i.l.bf16 %v4009_v20 }
 0x243   : > { %3411 = vmatmul.mubr.msk.bf16.gmra.mxu1 %vm1680_vm12, %v2410_v43  ;;  %v4006_v5 = vunpack.i.h.bf16 %v4004_v25  ;;  %v4005_v15 = vunpack.i.l.bf16 %v4004_v25 }
 0x244   : > { %v1546_v29 = vsel %vm1533_vm5, %v1529_v0, %v4010_v40  ;;  %v1547_v31 = vsel %vm1533_vm5, %v1530_v4, %v4011_v16 }
 0x245   : > { %v4019_v59 = vpop.permute.xlu1 %4018  ;;  %v1532_v21 = vsel %vm1516_vm4, %v4170_v63, %v4006_v5  ;;  %v1531_v14 = vsel %vm1516_vm4, %v4171_v32, %v4005_v15 }
 0x246   : > { %v4014_v42 = vpop.permute.xlu0 %4013  ;;  %v4021_v27 = vunpack.i.h.bf16 %v4019_v59  ;;  %v4020_v1 = vunpack.i.l.bf16 %v4019_v59 }
 0x247   : > { %v4016_v49 = vunpack.i.h.bf16 %v4014_v42  ;;  %v4015_v41 = vunpack.i.l.bf16 %v4014_v42 }
 0x248   : > { %v2305_v46 = vsel %vm1533_vm5, %v2289_v60, %v4020_v1  ;;  %v2306_v62 = vsel %vm1533_vm5, %v2290_v26, %v4021_v27 }
 0x249   : > { %v4029_v7 = vpop.permute.xlu1 %4028  ;;  %v2292_v9 = vsel %vm1516_vm4, %v4016_v49, %v4172_v55  ;;  %v2291_v35 = vsel %vm1516_vm4, %v4015_v41, %v4173_v58 }
 0x24a   : > { %v4024_v22 = vpop.permute.xlu0 %4023  ;;  %v4030_v11 = vunpack.i.l.bf16 %v4029_v7  ;;  %v4031_v33 = vunpack.i.h.bf16 %v4029_v7 }
 0x24b   : > { %v4026_v51 = vunpack.i.h.bf16 %v4024_v22  ;;  %v4025_v18 = vunpack.i.l.bf16 %v4024_v22 }
 0x24c   : > { %v1563_v34 = vsel %vm1550_vm6, %v1546_v29, %v4030_v11  ;;  %v1564_v43 = vsel %vm1550_vm6, %v1547_v31, %v4031_v33 }
 0x24d   : > { %v5477_v2 = vpop.permute.xlu1 %4038  ;;  %v1548_v20 = vsel %vm1533_vm5, %v1531_v14, %v4025_v18  ;;  %v1549_v25 = vsel %vm1533_vm5, %v1532_v21, %v4026_v51 }
 0x24e   : > { %v5479_v37 = vpop.permute.xlu0 %4033  ;;  %v4041_v61 = vunpack.i.h.bf16 %v5477_v2  ;;  %v4040_v38 = vunpack.i.l.bf16 %v5477_v2 }
 0x24f   : > { %v4036_v57 = vunpack.i.h.bf16 %v5479_v37  ;;  %v4035_v30 = vunpack.i.l.bf16 %v5479_v37 }
 0x250   : > { %v2321_v7 = vsel %vm1550_vm6, %v2305_v46, %v4040_v38  ;;  %v2322_v22 = vsel %vm1550_vm6, %v2306_v62, %v4041_v61 }
 0x251   : > { %v5481_v44 = vpop.permute.xlu1 %4048  ;;  %v2308_v28 = vsel %vm1533_vm5, %v2292_v9, %v4036_v57 }
 0x252   : > { %v5483_v8 = vpop.permute.xlu0 %4043  ;;  %v4051_v13 = vunpack.i.h.bf16 %v5481_v44  ;;  %v4050_v36 = vunpack.i.l.bf16 %v5481_v44  ;;  %v2307_v44 = vsel %vm1533_vm5, %v2291_v35, %v4035_v30 }
 0x253   : > { %v4045_v10 = vunpack.i.l.bf16 %v5483_v8  ;;  %v4046_v59 = vunpack.i.h.bf16 %v5483_v8 }
 0x254   : > { %v1580_v8 = vsel %vm1567_vm7, %v1563_v34, %v4050_v36  ;;  %v1581_v47 = vsel %vm1567_vm7, %v1564_v43, %v4051_v13 }
 0x255   : > { %v5485_v45 = vpop.permute.xlu1 %4058  ;;  %v1565_v16 = vsel %vm1550_vm6, %v1548_v20, %v4045_v10  ;;  %v1566_v15 = vsel %vm1550_vm6, %v1549_v25, %v4046_v59 }
 0x256   : > { %v5487_v52 = vpop.permute.xlu0 %4053  ;;  %v4061_v2 = vunpack.i.h.bf16 %v5485_v45  ;;  %v4060_v37 = vunpack.i.l.bf16 %v5485_v45 }
 0x257   : > { %v4056_v12 = vunpack.i.h.bf16 %v5487_v52  ;;  %v4055_v54 = vunpack.i.l.bf16 %v5487_v52 }
 0x258   : > { %v2337_v52 = vsel %vm1567_vm7, %v2321_v7, %v4060_v37  ;;  %v2338_v0 = vsel %vm1567_vm7, %v2322_v22, %v4061_v2 }
 0x259   : > { %v5489_v19 = vpop.permute.xlu1 %4068  ;;  %v2323_v23 = vsel %vm1550_vm6, %v2307_v44, %v4055_v54  ;;  %v2324_v26 = vsel %vm1550_vm6, %v2308_v28, %v4056_v12 }
 0x25a   : > { %v5491_v50 = vpop.permute.xlu0 %4063  ;;  %v4070_v40 = vunpack.i.l.bf16 %v5489_v19  ;;  %v4071_v45 = vunpack.i.h.bf16 %v5489_v19 }
 0x25b   : > { %v4066_v3 = vunpack.i.h.bf16 %v5491_v50  ;;  %v4065_v4 = vunpack.i.l.bf16 %v5491_v50 }
 0x25c   : > { %v1597_v50 = vsel %vm1584_vm8, %v1580_v8, %v4070_v40  ;;  %v1598_v31 = vsel %vm1584_vm8, %v1581_v47, %v4071_v45 }
 0x25d   : > { %v5493_v53 = vpop.permute.xlu1 %4078  ;;  %v1583_v63 = vsel %vm1567_vm7, %v1566_v15, %v4066_v3 }
 0x25e   : > { %v5495_v48 = vpop.permute.xlu0 %4073  ;;  %v4081_v27 = vunpack.i.h.bf16 %v5493_v53  ;;  %v4080_v1 = vunpack.i.l.bf16 %v5493_v53  ;;  %v1582_v53 = vsel %vm1567_vm7, %v1565_v16, %v4065_v4 }
 0x25f   : > { %v4076_v19 = vunpack.i.h.bf16 %v5495_v48  ;;  %v4075_v56 = vunpack.i.l.bf16 %v5495_v48 }
 0x260   : > { %v2353_v48 = vsel %vm1584_vm8, %v2337_v52, %v4080_v1  ;;  %v2354_v32 = vsel %vm1584_vm8, %v2338_v0, %v4081_v27 }
 0x261   : > { %v5509_v24 = vpop.permute.xlu1 %4088  ;;  %v2340_v51 = vsel %vm1567_vm7, %v2324_v26, %v4076_v19 }
 0x262   : > { %v5513_v17 = vpop.permute.xlu0 %4083  ;;  %v4091_v60 = vunpack.i.h.bf16 %v5509_v24  ;;  %v4090_v49 = vunpack.i.l.bf16 %v5509_v24  ;;  %v2339_v24 = vsel %vm1567_vm7, %v2323_v23, %v4075_v56 }
 0x263   : > { %v4085_v41 = vunpack.i.l.bf16 %v5513_v17  ;;  %v4086_v21 = vunpack.i.h.bf16 %v5513_v17 }
 0x264   : > { %v1614_v62 = vsel %vm1601_vm9, %v1597_v50, %v4090_v49  ;;  %v1615_v61 = vsel %vm1601_vm9, %v1598_v31, %v4091_v60 }
 0x265   : > { %v5529_v39 = vpop.permute.xlu1 %4098  ;;  %v1599_v17 = vsel %vm1584_vm8, %v1582_v53, %v4085_v41  ;;  %v1600_v9 = vsel %vm1584_vm8, %v1583_v63, %v4086_v21 }
 0x266   : > { %v5535_v42 = vpop.permute.xlu0 %4093  ;;  %v4101_v18 = vunpack.i.h.bf16 %v5529_v39  ;;  %v4100_v46 = vunpack.i.l.bf16 %v5529_v39 }
 0x267   : > { %v4095_v38 = vunpack.i.l.bf16 %v5535_v42  ;;  %v4096_v58 = vunpack.i.h.bf16 %v5535_v42 }
 0x268   : > { %v2369_v39 = vsel %vm1601_vm9, %v2353_v48, %v4100_v46  ;;  %v2370_v43 = vsel %vm1601_vm9, %v2354_v32, %v4101_v18 }
 0x269   : > { %v4109_v5 = vpop.permute.xlu1 %4108  ;;  %v2355_v59 = vsel %vm1584_vm8, %v2339_v24, %v4095_v38  ;;  %v2356_v4 = vsel %vm1584_vm8, %v2340_v51, %v4096_v58  ;;  %v5629_v38 = vld [vmem:[%s5827_s5 + $0x1] ss:$0 sm:$0xff] }
 0x26a   : > { %v5553_v6 = vpop.permute.xlu0 %4103  ;;  %v4111_v14 = vunpack.i.h.bf16 %v4109_v5  ;;  %v4110_v33 = vunpack.i.l.bf16 %v4109_v5 }
 0x26b   : > { %v4106_v42 = vunpack.i.h.bf16 %v5553_v6  ;;  %v4105_v7 = vunpack.i.l.bf16 %v5553_v6 }
 0x26c   : > { %v1631_v34 = vsel %vm1618_vm10, %v1614_v62, %v4110_v33  ;;  %v1632_v13 = vsel %vm1618_vm10, %v1615_v61, %v4111_v14  ;;  %v5615_v33 = vld [vmem:[%s5827_s5] ss:$0 sm:$0xff] }
 0x26d   : > { %v4119_v29 = vpop.permute.xlu1 %4118  ;;  %v1616_v6 = vsel %vm1601_vm9, %v1599_v17, %v4105_v7  ;;  %v1617_v52 = vsel %vm1601_vm9, %v1600_v9, %v4106_v42  ;;  %v5623_v61 = vld [vmem:[%s5828_s6] ss:$0 sm:$0xff] }
 0x26e   : > { %v4114_v11 = vpop.permute.xlu0 %4113  ;;  %v4121_v36 = vunpack.i.h.bf16 %v4119_v29  ;;  %v4120_v10 = vunpack.i.l.bf16 %v4119_v29 }
 0x26f   : > { %v4116_v37 = vunpack.i.h.bf16 %v4114_v11  ;;  %v4115_v44 = vunpack.i.l.bf16 %v4114_v11 }
 0x270   : > { %v2385_v8 = vsel %vm1618_vm10, %v2369_v39, %v4120_v10  ;;  %v2386_v47 = vsel %vm1618_vm10, %v2370_v43, %v4121_v36  ;;  %v5640_v10 = vld [vmem:[%s5828_s6 + $0x1] ss:$0 sm:$0xff] }
 0x271   : > { %v4129_v55 = vpop.permute.xlu1 %4128  ;;  %v2371_v1 = vsel %vm1601_vm9, %v2355_v59, %v4115_v44  ;;  %v2372_v23 = vsel %vm1601_vm9, %v2356_v4, %v4116_v37 }
 0x272   : > { %v4131_v35 = vunpack.i.h.bf16 %v4129_v55  ;;  %v4130_v57 = vunpack.i.l.bf16 %v4129_v55  ;;  %v4124_v30 = vpop.permute.xlu0 %4123 }
 0x273   : > { %v4126_v5 = vunpack.i.h.bf16 %v4124_v30  ;;  %v4125_v15 = vunpack.i.l.bf16 %v4124_v30 }
 0x274   : > { %v1648_v20 = vsel %vm1635_vm11, %v1631_v34, %v4130_v57  ;;  %v1649_v25 = vsel %vm1635_vm11, %v1632_v13, %v4131_v35 }
 0x275   : > { %v1658_v22 = vpack.c.bf16 %v1649_v25, %v1648_v20  ;;  %v4139_v2 = vpop.permute.xlu1 %4138  ;;  %v1633_v29 = vsel %vm1618_vm10, %v1616_v6, %v4125_v15  ;;  %v1634_v31 = vsel %vm1618_vm10, %v1617_v52, %v4126_v5 }
 0x276   : > { %v4141_v28 = vunpack.i.h.bf16 %v4139_v2  ;;  %v4140_v12 = vunpack.i.l.bf16 %v4139_v2  ;;  %v4134_v54 = vpop.permute.xlu0 %4133 }
 0x277   : > { %v4136_v16 = vunpack.i.h.bf16 %v4134_v54  ;;  %v4135_v40 = vunpack.i.l.bf16 %v4134_v54  ;;  %3392 = vmatprep.mubr.msk.bf16.mxu0 %vm1680_vm12, %v1658_v22 }
 0x278   : > { %v2401_v45 = vsel %vm1635_vm11, %v2385_v8, %v4140_v12  ;;  %v2402_v3 = vsel %vm1635_vm11, %v2386_v47, %v4141_v28 }
 0x279   : > { %v2411_v0 = vpack.c.bf16 %v2402_v3, %v2401_v45  ;;  %v4149_v27 = vpop.permute.xlu1 %4148  ;;  %v2387_v50 = vsel %vm1618_vm10, %v2371_v1, %v4135_v40  ;;  %v2388_v60 = vsel %vm1618_vm10, %v2372_v23, %v4136_v16 }
 0x27a   : > { %v4151_v26 = vunpack.i.h.bf16 %v4149_v27  ;;  %v4150_v19 = vunpack.i.l.bf16 %v4149_v27  ;;  %v4144_v56 = vpop.permute.xlu0 %4143 }
 0x27b   : > { %v4146_v49 = vunpack.i.h.bf16 %v4144_v56  ;;  %v4145_v41 = vunpack.i.l.bf16 %v4144_v56  ;;  %3414 = vmatprep.mubr.msk.bf16.mxu1 %vm1680_vm12, %v2411_v0 }
 0x27c   : > { %v2403_v53 = vsel %vm1635_vm11, %v2387_v50, %v4150_v19  ;;  %v2404_v63 = vsel %vm1635_vm11, %v2388_v60, %v4151_v26 }
 0x27d   : > { %v2412_v21 = vpack.c.bf16 %v2404_v63, %v2403_v53  ;;  %v1650_v11 = vsel %vm1635_vm11, %v1633_v29, %v4145_v41  ;;  %v1651_v48 = vsel %vm1635_vm11, %v1634_v31, %v4146_v49 }
 0x27e   : > { %v1659_v32 = vpack.c.bf16 %v1651_v48, %v1650_v11 }
 0x27f   : > { %v3382_v14 = vpop.f32.mrf.mxu0  ;;  %3415 = vmatmul.mubr.msk.bf16.gmra.mxu1 %vm1680_vm12, %v2412_v21 }
 0x280   : > { %3393 = vmatmul.mubr.msk.bf16.gmra.mxu0 %vm1680_vm12, %v1659_v32  ;;  %v1815_v18 = vmul.f32 %v3382_v14, %v5615_v33 }
 0x281   : > { %v1743_v24 = vpop.f32.mrf.mxu0 }
 0x282   : > { %v1813_v51 = vmul.f32 %v5615_v33, %v1743_v24  ;;  %v1838_v30 = vadd.f32 %v5623_v61, %v1815_v18 }
 0x283   : > { %v3383_v46 = vpop.f32.mrf.mxu0  ;;  %v3404_v62 = vpop.f32.mrf.mxu1 }
 0x284   : > { %v1816_v17 = vmul.f32 %v3383_v46, %v5615_v33  ;;  %v1836_v55 = vadd.f32 %v5623_v61, %v1813_v51  ;;  %v2568_v34 = vmul.f32 %v3404_v62, %v5629_v38  ;;  %v1854_v37 = vmax.f32 %v1838_v30, 0.0 }
 0x285   : > { %v1746_v9 = vpop.f32.mrf.mxu0  ;;  %v2495_v58 = vpop.f32.mrf.mxu1 }
 0x286   : > { %v1839_v35 = vadd.f32 %v5623_v61, %v1816_v17  ;;  %v1814_v57 = vmul.f32 %v5615_v33, %v1746_v9  ;;  %v2566_v13 = vmul.f32 %v5629_v38, %v2495_v58  ;;  %v1852_v20 = vmax.f32 %v1836_v55, 0.0 }
 0x287   : > { %v3405_v36 = vpop.f32.mrf.mxu1  ;;  %v2592_v44 = vadd.f32 %v5640_v10, %v2568_v34 }
 0x288   : > { %v1837_v39 = vadd.f32 %v5623_v61, %v1814_v57  ;;  %v2569_v43 = vmul.f32 %v3405_v36, %v5629_v38  ;;  %v1855_v25 = vmax.f32 %v1839_v35, 0.0  ;;  %v2590_v7 = vadd.f32 %v5640_v10, %v2566_v13 }
 0x289   : > { %v2498_v59 = vpop.f32.mrf.mxu1  ;;  %v2608_v40 = vmax.f32 %v2592_v44, 0.0 }
 0x28a   : > { %v1853_v42 = vmax.f32 %v1837_v39, 0.0  ;;  %v2593_v22 = vadd.f32 %v5640_v10, %v2569_v43  ;;  %v2567_v2 = vmul.f32 %v5629_v38, %v2498_v59  ;;  %v1869_v54 = vpack.c.bf16 %v1855_v25, %v1854_v37 }
 0x28b   : > { %v2606_v47 = vmax.f32 %v2590_v7, 0.0 }
 0x28c   : > { %v1868_v28 = vpack.c.bf16 %v1853_v42, %v1852_v20  ;;  %v2591_v12 = vadd.f32 %v5640_v10, %v2567_v2  ;;  %v2609_v8 = vmax.f32 %v2593_v22, 0.0 }
 0x28e   : > { %v2607_v16 = vmax.f32 %v2591_v12, 0.0  ;;  %3438 = vmatprep.mubr.msk.bf16.mxu1 %vm1516_vm4, %v1868_v28  ;;  %v2623_v15 = vpack.c.bf16 %v2609_v8, %v2608_v40 }
 0x28f   : > { %3439 = vmatmul.mubr.msk.bf16.vlgmr.msra.gmra.mxu1 %vm1516_vm4, %v1869_v54 }
 0x290   : > { %v2622_v5 = vpack.c.bf16 %v2607_v16, %v2606_v47 }
 0x292   : > { %3420 = vmatprep.mubr.msk.bf16.mxu0 %vm1516_vm4, %v2622_v5 }
 0x293   : > { %3421 = vmatmul.mubr.msk.bf16.vlgmr.msra.gmra.mxu0 %vm1516_vm4, %v2623_v15 }
 0x2bf   : > { %v3386_v45 = vpop.f32.mrf.mxu0 }
 0x2c0   : > { %v1819_v6 = vmul.f32 %v3386_v45, %v5615_v33 }
 0x2c1   : > { %v1759_v3 = vpop.f32.mrf.mxu0 }
 0x2c2   : > { %v1817_v4 = vmul.f32 %v5615_v33, %v1759_v3  ;;  %v1842_v50 = vadd.f32 %v5623_v61, %v1819_v6 }
 0x2c3   : > { %v3387_v52 = vpop.f32.mrf.mxu0  ;;  %v3408_v0 = vpop.f32.mrf.mxu1 }
 0x2c4   : > { %v1820_v27 = vmul.f32 %v3387_v52, %v5615_v33  ;;  %v1840_v1 = vadd.f32 %v5623_v61, %v1817_v4  ;;  %v2572_v60 = vmul.f32 %v3408_v0, %v5629_v38  ;;  %v1858_v24 = vmax.f32 %v1842_v50, 0.0 }
 0x2c5   : > { %v1762_v23 = vpop.f32.mrf.mxu0  ;;  %v2511_v26 = vpop.f32.mrf.mxu1 }
 0x2c6   : > { %v1843_v19 = vadd.f32 %v5623_v61, %v1820_v27  ;;  %v1818_v56 = vmul.f32 %v5615_v33, %v1762_v23  ;;  %v2570_v49 = vmul.f32 %v5629_v38, %v2511_v26  ;;  %v1856_v53 = vmax.f32 %v1840_v1, 0.0 }
 0x2c7   : > { %v3409_v41 = vpop.f32.mrf.mxu1  ;;  %v2596_v51 = vadd.f32 %v5640_v10, %v2572_v60 }
 0x2c8   : > { %v1841_v29 = vadd.f32 %v5623_v61, %v1818_v56  ;;  %v2573_v31 = vmul.f32 %v3409_v41, %v5629_v38  ;;  %v1859_v63 = vmax.f32 %v1843_v19, 0.0  ;;  %v2594_v48 = vadd.f32 %v5640_v10, %v2570_v49 }
 0x2c9   : > { %v2514_v21 = vpop.f32.mrf.mxu1  ;;  %v2612_v58 = vmax.f32 %v2596_v51, 0.0 }
 0x2ca   : > { %v1857_v11 = vmax.f32 %v1841_v29, 0.0  ;;  %v2597_v32 = vadd.f32 %v5640_v10, %v2573_v31  ;;  %v2571_v14 = vmul.f32 %v5629_v38, %v2514_v21  ;;  %v1871_v62 = vpack.c.bf16 %v1859_v63, %v1858_v24 }
 0x2cb   : > { %v2610_v55 = vmax.f32 %v2594_v48, 0.0 }
 0x2cc   : > { %v1870_v18 = vpack.c.bf16 %v1857_v11, %v1856_v53  ;;  %v2595_v46 = vadd.f32 %v5640_v10, %v2571_v14  ;;  %v2613_v17 = vmax.f32 %v2597_v32, 0.0 }
 0x2ce   : > { %v2611_v9 = vmax.f32 %v2595_v46, 0.0  ;;  %3442 = vmatprep.mubr.msk.bf16.mxu1 %vm1516_vm4, %v1870_v18  ;;  %v2625_v57 = vpack.c.bf16 %v2613_v17, %v2612_v58 }
 0x2cf   : > { %3443 = vmatmul.mubr.msk.bf16.gmra.mxu1 %vm1516_vm4, %v1871_v62 }
 0x2d0   : > { %v2624_v35 = vpack.c.bf16 %v2611_v9, %v2610_v55 }
 0x2d2   : > { %3424 = vmatprep.mubr.msk.bf16.mxu0 %vm1516_vm4, %v2624_v35 }
 0x2d3   : > { %3425 = vmatmul.mubr.msk.bf16.gmra.mxu0 %vm1516_vm4, %v2625_v57 }
 0x2ff   : > { %v3390_v30 = vpop.f32.mrf.mxu0 }
 0x300   : > { %v1823_v36 = vmul.f32 %v3390_v30, %v5615_v33 }
 0x301   : > { %v1775_v34 = vpop.f32.mrf.mxu0 }
 0x302   : > { %v1821_v13 = vmul.f32 %v5615_v33, %v1775_v34  ;;  %v1846_v2 = vadd.f32 %v5623_v61, %v1823_v36 }
 0x303   : > { %v3391_v39 = vpop.f32.mrf.mxu0  ;;  %v3412_v43 = vpop.f32.mrf.mxu1 }
 0x304   : > { %v1824_v20 = vmul.f32 %v3391_v39, %v5615_v33  ;;  %v1844_v25 = vadd.f32 %v5623_v61, %v1821_v13  ;;  %v2576_v37 = vmul.f32 %v3412_v43, %v5629_v38  ;;  %v1862_v3 = vmax.f32 %v1846_v2, 0.0 }
 0x305   : > { %v1778_v59 = vpop.f32.mrf.mxu0  ;;  %v2527_v42 = vpop.f32.mrf.mxu1 }
 0x306   : > { %v1847_v7 = vadd.f32 %v5623_v61, %v1824_v20  ;;  %v1822_v22 = vmul.f32 %v5615_v33, %v1778_v59  ;;  %v2574_v44 = vmul.f32 %v5629_v38, %v2527_v42  ;;  %v1860_v8 = vmax.f32 %v1844_v25, 0.0 }
 0x307   : > { %v3413_v28 = vpop.f32.mrf.mxu1  ;;  %v2600_v4 = vadd.f32 %v5640_v10, %v2576_v37  ;;  %v5725_v37 = vld [vmem:[%s5831_s9] ss:$0 sm:$0xff] }
 0x308   : > { %v1845_v12 = vadd.f32 %v5623_v61, %v1822_v22  ;;  %v2577_v54 = vmul.f32 %v3413_v28, %v5629_v38  ;;  %v1863_v47 = vmax.f32 %v1847_v7, 0.0  ;;  %v2598_v5 = vadd.f32 %v5640_v10, %v2574_v44  ;;  %v5717_v22 = vld [vmem:[%s5830_s8] ss:$0 sm:$0xff] }
 0x309   : > { %v2530_v16 = vpop.f32.mrf.mxu1  ;;  %v2616_v26 = vmax.f32 %v2600_v4, 0.0 }
 0x30a   : > { %v1861_v40 = vmax.f32 %v1845_v12, 0.0  ;;  %v2601_v15 = vadd.f32 %v5640_v10, %v2577_v54  ;;  %v2575_v45 = vmul.f32 %v5629_v38, %v2530_v16  ;;  %v1873_v0 = vpack.c.bf16 %v1863_v47, %v1862_v3 }
 0x30b   : > { %v2614_v1 = vmax.f32 %v2598_v5, 0.0 }
 0x30c   : > { %v1872_v6 = vpack.c.bf16 %v1861_v40, %v1860_v8  ;;  %v2599_v52 = vadd.f32 %v5640_v10, %v2575_v45  ;;  %v2617_v27 = vmax.f32 %v2601_v15, 0.0  ;;  %v2884_v8 = vld [vmem:[%s5720_s27 + $0x10] sm:$0xff]  ;;  %v2882_v15 = vld [vmem:[%s5720_s27] sm:$0xff] }
 0x30e   : > { %v2615_v23 = vmax.f32 %v2599_v52, 0.0  ;;  %3446 = vmatprep.mubr.msk.bf16.mxu1 %vm1516_vm4, %v1872_v6  ;;  %v2627_v56 = vpack.c.bf16 %v2617_v27, %v2616_v26  ;;  %v2885_v27 = vld [vmem:[%s5720_s27 + $0x18] sm:$0xff] }
 0x30f   : > { %3447 = vmatmul.mubr.msk.bf16.gmra.mxu1 %vm1516_vm4, %v1873_v0 }
 0x310   : > { %v2626_v19 = vpack.c.bf16 %v2615_v23, %v2614_v1 }
 0x312   : > { %3428 = vmatprep.mubr.msk.bf16.mxu0 %vm1516_vm4, %v2626_v19 }
 0x313   : > { %3429 = vmatmul.mubr.msk.bf16.gmra.mxu0 %vm1516_vm4, %v2627_v56  ;;  %v2883_v56 = vld [vmem:[%s5720_s27 + $0x8] sm:$0xff] }
 0x33f   : > { %v3416_v50 = vpop.f32.mrf.mxu1 }
 0x340   : > { %v3394_v60 = vpop.f32.mrf.mxu0  ;;  %v2580_v31 = vmul.f32 %v3416_v50, %v5629_v38 }
 0x341   : > { %v2543_v49 = vpop.f32.mrf.mxu1  ;;  %v1827_v21 = vmul.f32 %v3394_v60, %v5615_v33 }
 0x342   : > { %v1791_v41 = vpop.f32.mrf.mxu0  ;;  %v2578_v29 = vmul.f32 %v5629_v38, %v2543_v49  ;;  %v2604_v62 = vadd.f32 %v5640_v10, %v2580_v31 }
 0x343   : > { %v1825_v53 = vmul.f32 %v5615_v33, %v1791_v41  ;;  %v3417_v63 = vpop.f32.mrf.mxu1  ;;  %v1850_v58 = vadd.f32 %v5623_v61, %v1827_v21 }
 0x344   : > { %v3395_v11 = vpop.f32.mrf.mxu0  ;;  %v2581_v48 = vmul.f32 %v3417_v63, %v5629_v38  ;;  %v2602_v24 = vadd.f32 %v5640_v10, %v2578_v29 }
 0x345   : > { %v1828_v32 = vmul.f32 %v3395_v11, %v5615_v33  ;;  %v2546_v14 = vpop.f32.mrf.mxu1  ;;  %v1848_v17 = vadd.f32 %v5623_v61, %v1825_v53  ;;  %v1866_v20 = vmax.f32 %v1850_v58, 0.0 }
 0x346   : > { %v2605_v51 = vadd.f32 %v5640_v10, %v2581_v48  ;;  %v1794_v18 = vpop.f32.mrf.mxu0  ;;  %v2579_v46 = vmul.f32 %v5629_v38, %v2546_v14  ;;  %v2618_v34 = vmax.f32 %v2602_v24, 0.0  ;;  %v2620_v38 = vmax.f32 %v2604_v62, 0.0 }
 0x347   : > { %v1851_v55 = vadd.f32 %v5623_v61, %v1828_v32  ;;  %v1826_v9 = vmul.f32 %v5615_v33, %v1794_v18  ;;  %v1864_v39 = vmax.f32 %v1848_v17, 0.0 }
 0x348   : > { %v2603_v35 = vadd.f32 %v5640_v10, %v2579_v46  ;;  %v2621_v57 = vmax.f32 %v2605_v51, 0.0  ;;  %v2888_v51 = vld [vmem:[%s5720_s27 + $0x30] sm:$0xff] }
 0x349   : > { %v1849_v30 = vadd.f32 %v5623_v61, %v1826_v9  ;;  %v1867_v13 = vmax.f32 %v1851_v55, 0.0  ;;  %v2886_v55 = vld [vmem:[%s5720_s27 + $0x20] sm:$0xff] }
 0x34a   : > { %v2619_v36 = vmax.f32 %v2603_v35, 0.0  ;;  %v2629_v59 = vpack.c.bf16 %v2621_v57, %v2620_v38 }
 0x34b   : > { %v1865_v43 = vmax.f32 %v1849_v30, 0.0  ;;  %v1875_v33 = vpack.c.bf16 %v1867_v13, %v1866_v20  ;;  %v2889_v13 = vld [vmem:[%s5720_s27 + $0x38] sm:$0xff]  ;;  %v2887_v20 = vld [vmem:[%s5720_s27 + $0x28] sm:$0xff] }
 0x34c   : > { %v2628_v25 = vpack.c.bf16 %v2619_v36, %v2618_v34 }
 0x34d   : > { %v1874_v42 = vpack.c.bf16 %v1865_v43, %v1864_v39 }
 0x34e   : > { %3432 = vmatprep.mubr.msk.bf16.mxu0 %vm1516_vm4, %v2628_v25 }
 0x34f   : > { %3450 = vmatprep.mubr.msk.bf16.mxu1 %vm1516_vm4, %v1874_v42  ;;  %3433 = vmatmul.mubr.msk.bf16.gmra.mxu0 %vm1516_vm4, %v2629_v59  ;;  %v3440_v61 = vpop.f32.mrf.mxu1 }
 0x350   : > { %3451 = vmatmul.mubr.msk.bf16.gmra.mxu1 %vm1516_vm4, %v1875_v33 }
 0x351   : > { %v2817_v10 = vpop.f32.mrf.mxu1 }
 0x353   : > { %v3422_v7 = vpop.f32.mrf.mxu0  ;;  %v3441_v44 = vpop.f32.mrf.mxu1 }
 0x354   : > { %v2826_v2 = vadd.f32 %v3440_v61, %v3422_v7 }
 0x355   : > { %v2693_v28 = vpop.f32.mrf.mxu0  ;;  %v2820_v45 = vpop.f32.mrf.mxu1 }
 0x356   : > { %v2907_v12 = vmul.f32 %v5717_v22, %v2826_v2  ;;  %v2818_v54 = vadd.f32 %v2817_v10, %v2693_v28 }
 0x357   : > { %v3423_v47 = vpop.f32.mrf.mxu0 }
 0x358   : > { %v2930_v16 = vadd.f32 %v5725_v37, %v2907_v12  ;;  %v2905_v40 = vmul.f32 %v5717_v22, %v2818_v54  ;;  %v2829_v5 = vadd.f32 %v3441_v44, %v3423_v47 }
 0x359   : > { %v2696_v3 = vpop.f32.mrf.mxu0 }
 0x35a   : > { %v2946_v4 = vadd.f32 %v2930_v16, %v2884_v8  ;;  %v2928_v6 = vadd.f32 %v5725_v37, %v2905_v40  ;;  %v2908_v52 = vmul.f32 %v5717_v22, %v2829_v5  ;;  %v2821_v0 = vadd.f32 %v2820_v45, %v2696_v3  ;;  %v2892_v16 = vld [vmem:[%s5720_s27 + $0x50] sm:$0xff]  ;;  %v2890_v3 = vld [vmem:[%s5720_s27 + $0x40] sm:$0xff] }
 0x35c   : > { %v2962_v1 = vmax.f32 %v2946_v4, 0.0  ;;  %v2944_v23 = vadd.f32 %v2928_v6, %v2882_v15  ;;  %v2931_v26 = vadd.f32 %v5725_v37, %v2908_v52  ;;  %v2906_v19 = vmul.f32 %v5717_v22, %v2821_v0 }
 0x35e   : > { %2978 = vst.msk [vmem:[%s4320_s11 + $0x10] sm:$0xff] %vm1533_vm5, %v2962_v1  ;;  %v2960_v50 = vmax.f32 %v2944_v23, 0.0  ;;  %v2947_v60 = vadd.f32 %v2931_v26, %v2885_v27  ;;  %v2929_v49 = vadd.f32 %v5725_v37, %v2906_v19  ;;  %v2893_v23 = vld [vmem:[%s5720_s27 + $0x58] sm:$0xff] }
 0x360   : > { %2976 = vst.msk [vmem:[%s4320_s11] sm:$0xff] %vm1533_vm5, %v2960_v50  ;;  %v2963_v41 = vmax.f32 %v2947_v60, 0.0  ;;  %v2945_v29 = vadd.f32 %v2929_v49, %v2883_v56  ;;  %v2891_v60 = vld [vmem:[%s5720_s27 + $0x48] sm:$0xff] }
 0x362   : > { %2979 = vst.msk [vmem:[%s4320_s11 + $0x18] sm:$0xff] %vm1533_vm5, %v2963_v41  ;;  %v2961_v31 = vmax.f32 %v2945_v29, 0.0 }
 0x364   : > { %2977 = vst.msk [vmem:[%s4320_s11 + $0x8] sm:$0xff] %vm1533_vm5, %v2961_v31 }
 0x38f   : > { %v3444_v53 = vpop.f32.mrf.mxu1 }
 0x391   : > { %v2833_v63 = vpop.f32.mrf.mxu1 }
 0x393   : > { %v3426_v21 = vpop.f32.mrf.mxu0  ;;  %v3445_v48 = vpop.f32.mrf.mxu1 }
 0x394   : > { %v2842_v11 = vadd.f32 %v3444_v53, %v3426_v21 }
 0x395   : > { %v2709_v32 = vpop.f32.mrf.mxu0  ;;  %v2836_v9 = vpop.f32.mrf.mxu1 }
 0x396   : > { %v2911_v14 = vmul.f32 %v5717_v22, %v2842_v11  ;;  %v2834_v24 = vadd.f32 %v2833_v63, %v2709_v32 }
 0x397   : > { %v3427_v18 = vpop.f32.mrf.mxu0 }
 0x398   : > { %v2934_v46 = vadd.f32 %v5725_v37, %v2911_v14  ;;  %v2909_v62 = vmul.f32 %v5717_v22, %v2834_v24  ;;  %v2845_v17 = vadd.f32 %v3445_v48, %v3427_v18 }
 0x399   : > { %v2712_v58 = vpop.f32.mrf.mxu0 }
 0x39a   : > { %v2950_v35 = vadd.f32 %v2934_v46, %v2888_v51  ;;  %v2932_v57 = vadd.f32 %v5725_v37, %v2909_v62  ;;  %v2912_v30 = vmul.f32 %v5717_v22, %v2845_v17  ;;  %v2837_v34 = vadd.f32 %v2836_v9, %v2712_v58  ;;  %v2896_v46 = vld [vmem:[%s5720_s27 + $0x70] sm:$0xff] }
 0x39c   : > { %v2966_v36 = vmax.f32 %v2950_v35, 0.0  ;;  %v2948_v38 = vadd.f32 %v2932_v57, %v2886_v55  ;;  %v2935_v39 = vadd.f32 %v5725_v37, %v2912_v30  ;;  %v2910_v43 = vmul.f32 %v5717_v22, %v2837_v34  ;;  %v2894_v35 = vld [vmem:[%s5720_s27 + $0x60] sm:$0xff] }
 0x39e   : > { %2982 = vst.msk [vmem:[%s4320_s11 + $0x30] sm:$0xff] %vm1533_vm5, %v2966_v36  ;;  %v2964_v25 = vmax.f32 %v2948_v38, 0.0  ;;  %v2951_v59 = vadd.f32 %v2935_v39, %v2889_v13  ;;  %v2933_v42 = vadd.f32 %v5725_v37, %v2910_v43  ;;  %v2897_v38 = vld [vmem:[%s5720_s27 + $0x78] sm:$0xff] }
 0x3a0   : > { %2980 = vst.msk [vmem:[%s4320_s11 + $0x20] sm:$0xff] %vm1533_vm5, %v2964_v25  ;;  %v2967_v33 = vmax.f32 %v2951_v59, 0.0  ;;  %v2949_v61 = vadd.f32 %v2933_v42, %v2887_v20  ;;  %v2895_v59 = vld [vmem:[%s5720_s27 + $0x68] sm:$0xff] }
 0x3a2   : > { %2983 = vst.msk [vmem:[%s4320_s11 + $0x38] sm:$0xff] %vm1533_vm5, %v2967_v33  ;;  %v2965_v10 = vmax.f32 %v2949_v61, 0.0 }
 0x3a4   : > { %2981 = vst.msk [vmem:[%s4320_s11 + $0x28] sm:$0xff] %vm1533_vm5, %v2965_v10 }
 0x3cf   : > { %v3448_v7 = vpop.f32.mrf.mxu1 }
 0x3d1   : > { %v2849_v2 = vpop.f32.mrf.mxu1 }
 0x3d3   : > { %v3430_v44 = vpop.f32.mrf.mxu0  ;;  %v3449_v12 = vpop.f32.mrf.mxu1 }
 0x3d4   : > { %v2858_v28 = vadd.f32 %v3448_v7, %v3430_v44 }
 0x3d5   : > { %v2725_v54 = vpop.f32.mrf.mxu0  ;;  %v2852_v4 = vpop.f32.mrf.mxu1 }
 0x3d6   : > { %v2915_v8 = vmul.f32 %v5717_v22, %v2858_v28  ;;  %v2850_v47 = vadd.f32 %v2849_v2, %v2725_v54 }
 0x3d7   : > { %v3431_v40 = vpop.f32.mrf.mxu0 }
 0x3d8   : > { %v2938_v5 = vadd.f32 %v5725_v37, %v2915_v8  ;;  %v2913_v15 = vmul.f32 %v5717_v22, %v2850_v47  ;;  %v2861_v45 = vadd.f32 %v3449_v12, %v3431_v40 }
 0x3d9   : > { %v2728_v6 = vpop.f32.mrf.mxu0 }
 0x3da   : > { %v2954_v52 = vadd.f32 %v2938_v5, %v2892_v16  ;;  %v2936_v0 = vadd.f32 %v5725_v37, %v2913_v15  ;;  %v2916_v27 = vmul.f32 %v5717_v22, %v2861_v45  ;;  %v2853_v1 = vadd.f32 %v2852_v4, %v2728_v6 }
 0x3dc   : > { %v2970_v26 = vmax.f32 %v2954_v52, 0.0  ;;  %v2952_v19 = vadd.f32 %v2936_v0, %v2890_v3  ;;  %v2939_v56 = vadd.f32 %v5725_v37, %v2916_v27  ;;  %v2914_v50 = vmul.f32 %v5717_v22, %v2853_v1 }
 0x3de   : > { %2986 = vst.msk [vmem:[%s4320_s11 + $0x50] sm:$0xff] %vm1533_vm5, %v2970_v26  ;;  %v2968_v49 = vmax.f32 %v2952_v19, 0.0  ;;  %v2955_v41 = vadd.f32 %v2939_v56, %v2893_v23  ;;  %v2937_v29 = vadd.f32 %v5725_v37, %v2914_v50 }
 0x3e0   : > { %2984 = vst.msk [vmem:[%s4320_s11 + $0x40] sm:$0xff] %vm1533_vm5, %v2968_v49  ;;  %v2971_v31 = vmax.f32 %v2955_v41, 0.0  ;;  %v2953_v53 = vadd.f32 %v2937_v29, %v2891_v60 }
 0x3e2   : > { %2987 = vst.msk [vmem:[%s4320_s11 + $0x58] sm:$0xff] %vm1533_vm5, %v2971_v31  ;;  %v2969_v63 = vmax.f32 %v2953_v53, 0.0 }
 0x3e4   : > { %2985 = vst.msk [vmem:[%s4320_s11 + $0x48] sm:$0xff] %vm1533_vm5, %v2969_v63 }
 0x40f   : > { %v3434_v21 = vpop.f32.mrf.mxu0 }
 0x410   : > { %v3452_v11 = vpop.f32.mrf.mxu1 }
 0x411   : > { %v2874_v48 = vadd.f32 %v3452_v11, %v3434_v21  ;;  %v2741_v32 = vpop.f32.mrf.mxu0 }
 0x412   : > { %v2865_v14 = vpop.f32.mrf.mxu1 }
 0x413   : > { %v2919_v24 = vmul.f32 %v5717_v22, %v2874_v48  ;;  %v2866_v51 = vadd.f32 %v2865_v14, %v2741_v32  ;;  %v3435_v18 = vpop.f32.mrf.mxu0 }
 0x414   : > { %v3453_v62 = vpop.f32.mrf.mxu1 }
 0x415   : > { %v2942_v17 = vadd.f32 %v5725_v37, %v2919_v24  ;;  %v2917_v55 = vmul.f32 %v5717_v22, %v2866_v51  ;;  %v2877_v9 = vadd.f32 %v3453_v62, %v3435_v18  ;;  %v2744_v58 = vpop.f32.mrf.mxu0 }
 0x416   : > { %v2868_v57 = vpop.f32.mrf.mxu1 }
 0x417   : > { %v2958_v30 = vadd.f32 %v2942_v17, %v2896_v46  ;;  %v2940_v34 = vadd.f32 %v5725_v37, %v2917_v55  ;;  %v2920_v13 = vmul.f32 %v5717_v22, %v2877_v9  ;;  %v2869_v36 = vadd.f32 %v2868_v57, %v2744_v58 }
 0x419   : > { %v2974_v39 = vmax.f32 %v2958_v30, 0.0  ;;  %v2956_v43 = vadd.f32 %v2940_v34, %v2894_v35  ;;  %v2943_v20 = vadd.f32 %v5725_v37, %v2920_v13  ;;  %v2918_v25 = vmul.f32 %v5717_v22, %v2869_v36 }
 0x41b   : > { %2990 = vst.msk [vmem:[%s4320_s11 + $0x70] sm:$0xff] %vm1533_vm5, %v2974_v39  ;;  %v2972_v42 = vmax.f32 %v2956_v43, 0.0  ;;  %v2959_v33 = vadd.f32 %v2943_v20, %v2897_v38  ;;  %v2941_v61 = vadd.f32 %v5725_v37, %v2918_v25 }
 0x41d   : > { %2988 = vst.msk [vmem:[%s4320_s11 + $0x60] sm:$0xff] %vm1533_vm5, %v2972_v42  ;;  %v2975_v10 = vmax.f32 %v2959_v33, 0.0  ;;  %v2957_v7 = vadd.f32 %v2941_v61, %v2895_v59 }
 0x41f   : > { %2991 = vst.msk [vmem:[%s4320_s11 + $0x78] sm:$0xff] %vm1533_vm5, %v2975_v10  ;;  %v2973_v2 = vmax.f32 %v2957_v7, 0.0 }
 0x421   : > { %2989 = vst.msk [vmem:[%s4320_s11 + $0x68] sm:$0xff] %vm1533_vm5, %v2973_v2 }
 0x422 PF: > { %s20_s17 = sadd.s32 1, %s4212_s17   ;;  %s5840_s25 = sld [smem:[#allocation3_spill]] }
 0x423   : > { %p17_p8 = scmp.ge.s32.totalorder %s20_s17, 6   ;;  %s5841_s13 = smov %s4204_s15 }
 0x424   : > { %s5842_s14 = smov %s4208_s16  ;;  %s5843_s15 = smov %s5846_s18 }
 0x425   :  { %19 = sbr.rel (!%p17_p8) target bundleno = 3 (0x3), region = 103 }
 0x428   : > { %s5844_s16 = smov %s5840_s25 }

</bundles_post_ra>
